<compile_context>
chip_gen: v5e
topology: v5e:2x2
jax: 0.10.0
libtpu: 0.0.40
codegen_flags: <defaults>
</compile_context>

<pallas_src>
import functools
import math

import jax
import jax.numpy as jnp
from jax import lax
from jax.experimental import pallas as pl
from jax.experimental.pallas import tpu as pltpu


# ----------------------------------------------------------------------------
# Generation-aware VMEM budget and tile ladders
# ----------------------------------------------------------------------------
def _vmem_capacity_bytes():
    try:
        return int(pltpu.get_tpu_info().vmem_capacity_bytes)
    except Exception:
        return 64 * 1024 * 1024  # conservative default: v7x per-TensorCore VMEM


_VMEM_CAP = _vmem_capacity_bytes()
_BIG_VMEM = _VMEM_CAP >= 100 * 1024 * 1024            # v5e / v6e: 128 MiB VMEM
_VMEM_LIMIT = (96 if _BIG_VMEM else 44) * 1024 * 1024  # leave headroom on v7x
_TM_LADDER = ((1024, 512, 256, 128, 64, 32, 16, 8) if _BIG_VMEM
              else (512, 256, 128, 64, 32, 16, 8))
_TN_LADDER = (1024, 512, 256, 128) if _BIG_VMEM else (512, 256, 128)
_TQ_LADDER = (512, 256, 128, 64, 32, 16, 8)


def _pick_tile(dim, candidates):
    """Largest candidate that evenly divides `dim`, else the full dim."""
    for c in candidates:
        if dim >= c and dim % c == 0:
            return c
    return dim


def _heads_per_group(num_heads, head_dim):
    """Group heads so the attention block lane width is a multiple of 128."""
    if head_dim % 128 == 0:
        return 1
    for hpg in range(1, num_heads + 1):
        if num_heads % hpg == 0 and (hpg * head_dim) % 128 == 0 and hpg * head_dim <= 512:
            return hpg
    return num_heads  # last resort: one group spanning all heads (lane width = E)


# ----------------------------------------------------------------------------
# Kernel 1: fused LayerNorm + Linear (+ optional GELU), LN cached across N tiles
# ----------------------------------------------------------------------------
def _ln_linear_kernel(x_ref, g_ref, be_ref, w_ref, b_ref, o_ref, xn_ref, *, eps, gelu):
    # LayerNorm is computed only for the first N tile of each row tile and the
    # bf16-normalized result is cached in VMEM scratch for the remaining tiles.
    @pl.when(pl.program_id(1) == 0)
    def _():
        x = x_ref[...].astype(jnp.float32)
        mu = jnp.mean(x, axis=-1, keepdims=True)
        xc = x - mu
        var = jnp.mean(xc * xc, axis=-1, keepdims=True)
        xn = xc * lax.rsqrt(var + eps)
        xn = xn * g_ref[...].astype(jnp.float32) + be_ref[...].astype(jnp.float32)
        xn_ref[...] = xn.astype(xn_ref.dtype)

    y = jnp.dot(xn_ref[...], w_ref[...], preferred_element_type=jnp.float32)
    y = y + b_ref[...].astype(jnp.float32)
    if gelu:  # tanh-approximate GELU (EUP tanh)
        c = 0.7978845608028654  # sqrt(2/pi)
        y = 0.5 * y * (1.0 + jnp.tanh(c * (y + 0.044715 * (y * y * y))))
    o_ref[...] = y.astype(o_ref.dtype)


def ln_linear(x, gamma, beta, w_t, bias, *, eps=1e-5, gelu=False, out_dtype=None):
    """x: (M, K) -> LayerNorm over K, then @ w_t (K, N) + bias (1, N)."""
    M, K = x.shape
    _, N = w_t.shape
    out_dtype = out_dtype or x.dtype
    tm = _pick_tile(M, _TM_LADDER)
    tn = _pick_tile(N, _TN_LADDER)
    grid = (M // tm, N // tn)

    flops = 2 * M * K * N + 10 * M * K
    bytes_accessed = int(M * K * x.dtype.itemsize
                         + (M // tm) * K * N * w_t.dtype.itemsize
                         + M * N * jnp.dtype(out_dtype).itemsize)

    return pl.pallas_call(
        functools.partial(_ln_linear_kernel, eps=eps, gelu=gelu),
        out_shape=jax.ShapeDtypeStruct((M, N), out_dtype),
        grid_spec=pltpu.PrefetchScalarGridSpec(
            num_scalar_prefetch=0,
            grid=grid,
            in_specs=[
                pl.BlockSpec((tm, K), lambda i, j: (i, 0)),
                pl.BlockSpec((1, K), lambda i, j: (0, 0)),
                pl.BlockSpec((1, K), lambda i, j: (0, 0)),
                pl.BlockSpec((K, tn), lambda i, j: (0, j)),
                pl.BlockSpec((1, tn), lambda i, j: (0, j)),
            ],
            out_specs=pl.BlockSpec((tm, tn), lambda i, j: (i, j)),
            scratch_shapes=[pltpu.VMEM((tm, K), jnp.bfloat16)],
        ),
        compiler_params=pltpu.CompilerParams(
            # j must be 'arbitrary': the cached LN scratch requires each core to
            # visit j == 0 before j > 0 for every row tile it owns.
            dimension_semantics=("parallel", "arbitrary"),
            vmem_limit_bytes=_VMEM_LIMIT,
        ),
        cost_estimate=pl.CostEstimate(
            flops=flops,
            transcendentals=(M * N if gelu else 0),
            bytes_accessed=bytes_accessed,
        ),
    )(x, gamma, beta, w_t, bias)


# ----------------------------------------------------------------------------
# Kernel 2: fused multi-head self-attention reading the (M, 3E) QKV tensor
# ----------------------------------------------------------------------------
def _attn_kernel(q_ref, k_ref, v_ref, o_ref, *, scale, heads_per_group, head_dim):
    q = q_ref[...]          # (tq, hpg*Dh)
    k = k_ref[...]          # (S,  hpg*Dh)
    v = v_ref[...]          # (S,  hpg*Dh)
    outs = []
    for h in range(heads_per_group):  # static, small unrolled loop
        lo = h * head_dim
        hi = lo + head_dim
        qh = q[:, lo:hi]
        kh = k[:, lo:hi]
        vh = v[:, lo:hi]
        s = lax.dot_general(qh, kh, (((1,), (1,)), ((), ())),
                            preferred_element_type=jnp.float32) * scale   # (tq, S)
        m = jnp.max(s, axis=-1, keepdims=True)
        p = jnp.exp(s - m)
        l = jnp.sum(p, axis=-1, keepdims=True)
        oh = jnp.dot(p.astype(vh.dtype), vh,
                     preferred_element_type=jnp.float32)                  # (tq, Dh)
        outs.append(oh / l)
    o = outs[0] if heads_per_group == 1 else jnp.concatenate(outs, axis=-1)
    o_ref[...] = o.astype(o_ref.dtype)


def mha_fused(qkv, *, batch, seq, num_heads, head_dim, scale, out_dtype=None):
    """qkv: (M, 3E) with columns [q | k | v], heads contiguous (Dh each).

    Returns attention output in (M, E) layout (heads concatenated), ready for
    the out-projection.  No XLA reshapes/transposes are required around it.
    """
    M, three_e = qkv.shape
    E = num_heads * head_dim
    assert three_e == 3 * E and M == batch * seq
    out_dtype = out_dtype or qkv.dtype

    hpg = _heads_per_group(num_heads, head_dim)
    G = num_heads // hpg          # head groups
    cw = hpg * head_dim           # column block width (lane-dense when possible)
    tq = _pick_tile(seq, _TQ_LADDER)
    n_qt = seq // tq
    grid = (batch, G, n_qt)

    def q_map(b, g, qi):
        return (b * n_qt + qi, g)

    def k_map(b, g, qi):
        return (b, G + g)

    def v_map(b, g, qi):
        return (b, 2 * G + g)

    def o_map(b, g, qi):
        return (b * n_qt + qi, g)

    bytes_accessed = int(M * E * qkv.dtype.itemsize                      # Q once
                         + 2 * n_qt * M * E * qkv.dtype.itemsize         # K/V re-stream
                         + M * E * jnp.dtype(out_dtype).itemsize)        # output

    return pl.pallas_call(
        functools.partial(_attn_kernel, scale=scale,
                          heads_per_group=hpg, head_dim=head_dim),
        out_shape=jax.ShapeDtypeStruct((M, E), out_dtype),
        grid_spec=pltpu.PrefetchScalarGridSpec(
            num_scalar_prefetch=0,
            grid=grid,
            in_specs=[
                pl.BlockSpec((tq, cw), q_map),
                pl.BlockSpec((seq, cw), k_map),
                pl.BlockSpec((seq, cw), v_map),
            ],
            out_specs=pl.BlockSpec((tq, cw), o_map),
        ),
        compiler_params=pltpu.CompilerParams(
            dimension_semantics=("parallel", "parallel", "parallel"),
            vmem_limit_bytes=_VMEM_LIMIT,
        ),
        cost_estimate=pl.CostEstimate(
            flops=4 * batch * num_heads * seq * seq * head_dim,
            transcendentals=batch * num_heads * seq * seq,
            bytes_accessed=bytes_accessed,
        ),
    )(qkv, qkv, qkv)


# ----------------------------------------------------------------------------
# Kernel 3: Linear + bias + residual (full contraction dim per step)
# ----------------------------------------------------------------------------
def _linear_res_kernel(x_ref, w_ref, b_ref, r_ref, o_ref):
    y = jnp.dot(x_ref[...], w_ref[...], preferred_element_type=jnp.float32)
    o_ref[...] = (y
                  + b_ref[...].astype(jnp.float32)
                  + r_ref[...].astype(jnp.float32)).astype(o_ref.dtype)


def linear_bias_residual(x, w_t, bias, residual, *, out_dtype=None):
    """out = x @ w_t + bias + residual.  x: (M, K), w_t: (K, N), residual: (M, N)."""
    M, K = x.shape
    _, N = w_t.shape
    out_dtype = out_dtype or residual.dtype
    tm = _pick_tile(M, _TM_LADDER)
    tn = _pick_tile(N, _TN_LADDER)
    grid = (M // tm, N // tn)

    flops = 2 * M * K * N
    bytes_accessed = int(M * K * x.dtype.itemsize
                         + (M // tm) * K * N * w_t.dtype.itemsize
                         + M * N * residual.dtype.itemsize
                         + M * N * jnp.dtype(out_dtype).itemsize)

    return pl.pallas_call(
        _linear_res_kernel,
        out_shape=jax.ShapeDtypeStruct((M, N), out_dtype),
        grid_spec=pltpu.PrefetchScalarGridSpec(
            num_scalar_prefetch=0,
            grid=grid,
            in_specs=[
                pl.BlockSpec((tm, K), lambda i, j: (i, 0)),
                pl.BlockSpec((K, tn), lambda i, j: (0, j)),
                pl.BlockSpec((1, tn), lambda i, j: (0, j)),
                pl.BlockSpec((tm, tn), lambda i, j: (i, j)),
            ],
            out_specs=pl.BlockSpec((tm, tn), lambda i, j: (i, j)),
        ),
        compiler_params=pltpu.CompilerParams(
            dimension_semantics=("parallel", "parallel"),
            vmem_limit_bytes=_VMEM_LIMIT,
        ),
        cost_estimate=pl.CostEstimate(
            flops=flops, transcendentals=0, bytes_accessed=bytes_accessed),
    )(x, w_t, bias, residual)


# ----------------------------------------------------------------------------
# Full encoder block forward
# ----------------------------------------------------------------------------
def prepare_params(raw):
    """One-time weight layout prep: transpose for (K, N) matmuls, cast to bf16."""
    E = raw["ln1_g"].shape[0]
    f32 = jnp.float32
    bf16 = jnp.bfloat16
    return dict(
        ln1_g=raw["ln1_g"].reshape(1, E).astype(f32),
        ln1_b=raw["ln1_b"].reshape(1, E).astype(f32),
        w_qkv_t=raw["w_in"].T.astype(bf16),          # (E, 3E)
        b_qkv=raw["b_in"].reshape(1, -1).astype(f32),
        w_out_t=raw["w_out"].T.astype(bf16),         # (E, E)
        b_out=raw["b_out"].reshape(1, -1).astype(f32),
        ln2_g=raw["ln2_g"].reshape(1, E).astype(f32),
        ln2_b=raw["ln2_b"].reshape(1, E).astype(f32),
        w_fc1_t=raw["w_fc1"].T.astype(bf16),         # (E, mlp)
        b_fc1=raw["b_fc1"].reshape(1, -1).astype(f32),
        w_fc2_t=raw["w_fc2"].T.astype(bf16),         # (mlp, E)
        b_fc2=raw["b_fc2"].reshape(1, -1).astype(f32),
    )


def transformer_encoder_block(x, params, *, num_heads, ln_eps=1e-5):
    B, S, E = x.shape
    H = num_heads
    Dh = E // H
    M = B * S
    x2d = x.reshape(M, E)  # layout no-op

    # ---- MSA block: LN1 + QKV projection (fused), attention, out-proj + residual
    qkv = ln_linear(x2d, params["ln1_g"], params["ln1_b"],
                    params["w_qkv_t"], params["b_qkv"],
                    eps=ln_eps, gelu=False, out_dtype=jnp.bfloat16)   # (M, 3E)

    attn = mha_fused(qkv, batch=B, seq=S, num_heads=H, head_dim=Dh,
                     scale=1.0 / math.sqrt(Dh),
                     out_dtype=jnp.bfloat16)                          # (M, E)

    x_msa = linear_bias_residual(attn, params["w_out_t"], params["b_out"],
                                 x2d, out_dtype=x.dtype)              # (M, E)

    # ---- MLP block: LN2 + FC1 + GELU (fused), FC2 + residual
    h = ln_linear(x_msa, params["ln2_g"], params["ln2_b"],
                  params["w_fc1_t"], params["b_fc1"],
                  eps=ln_eps, gelu=True, out_dtype=jnp.bfloat16)      # (M, mlp)
    out = linear_bias_residual(h, params["w_fc2_t"], params["b_fc2"],
                               x_msa, out_dtype=x.dtype)              # (M, E)
    return out.reshape(B, S, E)


# ----------------------------------------------------------------------------
# Pure-JAX reference (same math as the PyTorch forward, eval mode)
# ----------------------------------------------------------------------------
def _ln_ref(x, g, b, eps):
    mu = x.mean(-1, keepdims=True)
    var = ((x - mu) ** 2).mean(-1, keepdims=True)
    return (x - mu) / jnp.sqrt(var + eps) * g + b


def _gelu_tanh(x):
    c = 0.7978845608028654
    return 0.5 * x * (1.0 + jnp.tanh(c * (x + 0.044715 * x ** 3)))


def reference_forward(x, w, num_heads, eps=1e-5):
    B, S, E = x.shape
    H = num_heads
    Dh = E // H

    h = _ln_ref(x, w["ln1_g"], w["ln1_b"], eps)
    qkv = h @ w["w_in"].T + w["b_in"]
    q, k, v = jnp.split(qkv, 3, axis=-1)

    def heads(t):
        return t.reshape(B, S, H, Dh).transpose(0, 2, 1, 3)

    q, k, v = heads(q), heads(k), heads(v)
    s = jnp.einsum("bhqd,bhkd->bhqk", q, k) / math.sqrt(Dh)
    p = jax.nn.softmax(s, axis=-1)
    a = jnp.einsum("bhqk,bhkd->bhqd", p, v)
    a = a.transpose(0, 2, 1, 3).reshape(B, S, E)
    x = a @ w["w_out"].T + w["b_out"] + x

    h = _ln_ref(x, w["ln2_g"], w["ln2_b"], eps)
    h = _gelu_tanh(h @ w["w_fc1"].T + w["b_fc1"])
    x = h @ w["w_fc2"].T + w["b_fc2"] + x
    return x


if __name__ == "__main__":
    # Small deterministic config chosen so all lane dims are 128-aligned:
    # batch=2, seq=16, embedding_dim=128, heads=2 (head_dim=64 -> head-pair
    # groups give 128-lane-dense attention blocks), mlp=256.
    B, S, E, H, MLP = 2, 16, 128, 2, 256

    key = jax.random.PRNGKey(0)
    ks = jax.random.split(key, 13)
    x = jax.random.normal(ks[0], (B, S, E), dtype=jnp.float32)

    raw = dict(
        ln1_g=1.0 + 0.1 * jax.random.normal(ks[1], (E,), jnp.float32),
        ln1_b=0.1 * jax.random.normal(ks[2], (E,), jnp.float32),
        w_in=0.02 * jax.random.normal(ks[3], (3 * E, E), jnp.float32),
        b_in=0.02 * jax.random.normal(ks[4], (3 * E,), jnp.float32),
        w_out=0.02 * jax.random.normal(ks[5], (E, E), jnp.float32),
        b_out=0.02 * jax.random.normal(ks[6], (E,), jnp.float32),
        ln2_g=1.0 + 0.1 * jax.random.normal(ks[7], (E,), jnp.float32),
        ln2_b=0.1 * jax.random.normal(ks[8], (E,), jnp.float32),
        w_fc1=0.02 * jax.random.normal(ks[9], (MLP, E), jnp.float32),
        b_fc1=0.02 * jax.random.normal(ks[10], (MLP,), jnp.float32),
        w_fc2=0.02 * jax.random.normal(ks[11], (E, MLP), jnp.float32),
        b_fc2=0.02 * jax.random.normal(ks[12], (E,), jnp.float32),
    )
    params = prepare_params(raw)

    fwd = jax.jit(functools.partial(transformer_encoder_block, num_heads=H))
    out = fwd(x, params)
    out = jax.block_until_ready(out)

    ref = reference_forward(x, raw, H)

    assert out.shape == (B, S, E)
    assert jnp.allclose(out.astype(jnp.float32), ref, atol=2e-2, rtol=2e-2), (
        float(jnp.max(jnp.abs(out.astype(jnp.float32) - ref))))
    print("KERNEL_OK")
</pallas_src>

<mosaic_0001>
module attributes {stable_mosaic.version = 11 : i64} {
  func.func @_linear_res_kernel(%arg0: i32, %arg1: i32, %arg2: memref<32x128xbf16, #tpu.memory_space<vmem>>, %arg3: memref<128x128xbf16, #tpu.memory_space<vmem>>, %arg4: memref<1x128xf32, #tpu.memory_space<vmem>>, %arg5: memref<32x128xf32, #tpu.memory_space<vmem>>, %arg6: memref<32x128xf32, #tpu.memory_space<vmem>>) attributes {dimension_semantics = [#tpu.dimension_semantics<parallel>, #tpu.dimension_semantics<parallel>], iteration_bounds = array<i64: 1, 1>, scalar_prefetch = 0 : i64, scratch_operands = 0 : i64, tpu.core_type = #tpu.core_type<tc>, window_params = [{transform_indices = @transform_0, window_bounds = array<i64: 32, 128>}, {transform_indices = @transform_1, window_bounds = array<i64: 128, 128>}, {transform_indices = @transform_2, window_bounds = array<i64: 1, 128>}, {transform_indices = @transform_3, window_bounds = array<i64: 32, 128>}, {transform_indices = @transform_4, window_bounds = array<i64: 32, 128>}]} {
    %c0 = arith.constant 0 : index
    %c0_0 = arith.constant 0 : index
    %0 = vector.load %arg2[%c0, %c0_0] : memref<32x128xbf16, #tpu.memory_space<vmem>>, vector<32x128xbf16>
    %c0_1 = arith.constant 0 : index
    %c0_2 = arith.constant 0 : index
    %1 = vector.load %arg3[%c0_1, %c0_2] : memref<128x128xbf16, #tpu.memory_space<vmem>>, vector<128x128xbf16>
    %cst = arith.constant dense<0.000000e+00> : vector<32x128xf32>
    %2 = tpu.matmul %0, %1, %cst {dimension_numbers = #tpu.dot_dimension_numbers<[1], [0], [0], [1], [0, 0, 1, 1], [], []>} : vector<32x128xbf16>, vector<128x128xbf16>, vector<32x128xf32> -> vector<32x128xf32>
    %c0_3 = arith.constant 0 : index
    %c0_4 = arith.constant 0 : index
    %3 = vector.load %arg4[%c0_3, %c0_4] : memref<1x128xf32, #tpu.memory_space<vmem>>, vector<1x128xf32>
    %4 = vector.broadcast %3 : vector<1x128xf32> to vector<32x128xf32>
    %5 = arith.addf %2, %4 : vector<32x128xf32>
    %c0_5 = arith.constant 0 : index
    %c0_6 = arith.constant 0 : index
    %6 = vector.load %arg5[%c0_5, %c0_6] : memref<32x128xf32, #tpu.memory_space<vmem>>, vector<32x128xf32>
    %7 = arith.addf %5, %6 : vector<32x128xf32>
    %c0_7 = arith.constant 0 : index
    %c0_8 = arith.constant 0 : index
    %8 = vector.load %arg6[%c0_7, %c0_8] : memref<32x128xf32, #tpu.memory_space<vmem>>, vector<32x128xf32>
    tpu.vector_store %arg6[%c0_7, %c0_8], %7 {strides = array<i32>} : memref<32x128xf32, #tpu.memory_space<vmem>>, vector<32x128xf32>,
    return
  }
  func.func @transform_0(%arg0: i32, %arg1: i32) -> (i32, i32) {
    %c0_i32 = arith.constant 0 : i32
    %c0_i32_0 = arith.constant 0 : i32
    return %arg0, %c0_i32 : i32, i32
  }
  func.func @transform_1(%arg0: i32, %arg1: i32) -> (i32, i32) {
    %c0_i32 = arith.constant 0 : i32
    %c0_i32_0 = arith.constant 0 : i32
    return %c0_i32, %arg1 : i32, i32
  }
  func.func @transform_2(%arg0: i32, %arg1: i32) -> (i32, i32) {
    %c0_i32 = arith.constant 0 : i32
    %c0_i32_0 = arith.constant 0 : i32
    return %c0_i32, %arg1 : i32, i32
  }
  func.func @transform_3(%arg0: i32, %arg1: i32) -> (i32, i32) {
    %c0_i32 = arith.constant 0 : i32
    return %arg0, %arg1 : i32, i32
  }
  func.func @transform_4(%arg0: i32, %arg1: i32) -> (i32, i32) {
    %c0_i32 = arith.constant 0 : i32
    return %arg0, %arg1 : i32, i32
  }
}

module attributes {stable_mosaic.version = 11 : i64} {
  func.func @_ln_linear_kernel(%arg0: i32, %arg1: i32, %arg2: memref<32x128xf32, #tpu.memory_space<vmem>>, %arg3: memref<1x128xf32, #tpu.memory_space<vmem>>, %arg4: memref<1x128xf32, #tpu.memory_space<vmem>>, %arg5: memref<128x256xbf16, #tpu.memory_space<vmem>>, %arg6: memref<1x256xf32, #tpu.memory_space<vmem>>, %arg7: memref<32x256xbf16, #tpu.memory_space<vmem>>, %arg8: memref<32x128xbf16, #tpu.memory_space<vmem>>) attributes {dimension_semantics = [#tpu.dimension_semantics<parallel>, #tpu.dimension_semantics<arbitrary>], iteration_bounds = array<i64: 1, 1>, scalar_prefetch = 0 : i64, scratch_operands = 1 : i64, tpu.core_type = #tpu.core_type<tc>, window_params = [{transform_indices = @transform_0, window_bounds = array<i64: 32, 128>}, {pipeline_mode = #tpu.pipeline_mode<synchronous>, transform_indices = @transform_1, window_bounds = array<i64: 1, 128>}, {pipeline_mode = #tpu.pipeline_mode<synchronous>, transform_indices = @transform_2, window_bounds = array<i64: 1, 128>}, {transform_indices = @transform_3, window_bounds = array<i64: 128, 256>}, {transform_indices = @transform_4, window_bounds = array<i64: 1, 256>}, {transform_indices = @transform_5, window_bounds = array<i64: 32, 256>}]} {
    %c0_i32 = arith.constant 0 : i32
    %0 = arith.cmpi eq, %arg1, %c0_i32 : i32
    %1 = arith.extui %0 : i1 to i32
    %c0_i32_0 = arith.constant 0 : i32
    %2 = arith.cmpi ne, %1, %c0_i32_0 : i32
    scf.if %2 {
      %c0_12 = arith.constant 0 : index
      %c0_13 = arith.constant 0 : index
      %24 = vector.load %arg2[%c0_12, %c0_13] : memref<32x128xf32, #tpu.memory_space<vmem>>, vector<32x128xf32>
      %cst_14 = arith.constant dense<0.000000e+00> : vector<32xf32>
      %25 = vector.multi_reduction <add>, %24, %cst_14 [1] : vector<32x128xf32> to vector<32xf32>
      %26 = vector.shape_cast %25 : vector<32xf32> to vector<32x1xf32>
      %cst_15 = arith.constant 1.280000e+02 : f32
      %27 = vector.broadcast %cst_15 : f32 to vector<32x1xf32>
      %28 = arith.divf %26, %27 : vector<32x1xf32>
      %29 = vector.broadcast %28 : vector<32x1xf32> to vector<32x128xf32>
      %30 = arith.subf %24, %29 : vector<32x128xf32>
      %31 = arith.mulf %30, %30 : vector<32x128xf32>
      %cst_16 = arith.constant dense<0.000000e+00> : vector<32xf32>
      %32 = vector.multi_reduction <add>, %31, %cst_16 [1] : vector<32x128xf32> to vector<32xf32>
      %33 = vector.shape_cast %32 : vector<32xf32> to vector<32x1xf32>
      %cst_17 = arith.constant 1.280000e+02 : f32
      %34 = vector.broadcast %cst_17 : f32 to vector<32x1xf32>
      %35 = arith.divf %33, %34 : vector<32x1xf32>
      %cst_18 = arith.constant 9.99999974E-6 : f32
      %36 = vector.broadcast %cst_18 : f32 to vector<32x1xf32>
      %37 = arith.addf %35, %36 : vector<32x1xf32>
      %38 = math.rsqrt %37 : vector<32x1xf32>
      %39 = vector.broadcast %38 : vector<32x1xf32> to vector<32x128xf32>
      %40 = arith.mulf %30, %39 : vector<32x128xf32>
      %c0_19 = arith.constant 0 : index
      %c0_20 = arith.constant 0 : index
      %41 = vector.load %arg3[%c0_19, %c0_20] : memref<1x128xf32, #tpu.memory_space<vmem>>, vector<1x128xf32>
      %42 = vector.broadcast %41 : vector<1x128xf32> to vector<32x128xf32>
      %43 = arith.mulf %40, %42 : vector<32x128xf32>
      %c0_21 = arith.constant 0 : index
      %c0_22 = arith.constant 0 : index
      %44 = vector.load %arg4[%c0_21, %c0_22] : memref<1x128xf32, #tpu.memory_space<vmem>>, vector<1x128xf32>
      %45 = vector.broadcast %44 : vector<1x128xf32> to vector<32x128xf32>
      %46 = arith.addf %43, %45 : vector<32x128xf32>
      %47 = arith.truncf %46 : vector<32x128xf32> to vector<32x128xbf16>
      %c0_23 = arith.constant 0 : index
      %c0_24 = arith.constant 0 : index
      %48 = vector.load %arg8[%c0_23, %c0_24] : memref<32x128xbf16, #tpu.memory_space<vmem>>, vector<32x128xbf16>
      tpu.vector_store %arg8[%c0_23, %c0_24], %47 {strides = array<i32>} : memref<32x128xbf16, #tpu.memory_space<vmem>>, vector<32x128xbf16>,
    } else {
    }
    %c0 = arith.constant 0 : index
    %c0_1 = arith.constant 0 : index
    %3 = vector.load %arg8[%c0, %c0_1] : memref<32x128xbf16, #tpu.memory_space<vmem>>, vector<32x128xbf16>
    %c0_2 = arith.constant 0 : index
    %c0_3 = arith.constant 0 : index
    %4 = vector.load %arg5[%c0_2, %c0_3] : memref<128x256xbf16, #tpu.memory_space<vmem>>, vector<128x256xbf16>
    %cst = arith.constant dense<0.000000e+00> : vector<32x256xf32>
    %5 = tpu.matmul %3, %4, %cst {dimension_numbers = #tpu.dot_dimension_numbers<[1], [0], [0], [1], [0, 0, 1, 1], [], []>} : vector<32x128xbf16>, vector<128x256xbf16>, vector<32x256xf32> -> vector<32x256xf32>
    %c0_4 = arith.constant 0 : index
    %c0_5 = arith.constant 0 : index
    %6 = vector.load %arg6[%c0_4, %c0_5] : memref<1x256xf32, #tpu.memory_space<vmem>>, vector<1x256xf32>
    %7 = vector.broadcast %6 : vector<1x256xf32> to vector<32x256xf32>
    %8 = arith.addf %5, %7 : vector<32x256xf32>
    %cst_6 = arith.constant 5.000000e-01 : f32
    %9 = vector.broadcast %cst_6 : f32 to vector<32x256xf32>
    %10 = arith.mulf %9, %8 : vector<32x256xf32>
    %11 = arith.mulf %8, %8 : vector<32x256xf32>
    %12 = arith.mulf %11, %8 : vector<32x256xf32>
    %cst_7 = arith.constant 4.471500e-02 : f32
    %13 = vector.broadcast %cst_7 : f32 to vector<32x256xf32>
    %14 = arith.mulf %13, %12 : vector<32x256xf32>
    %15 = arith.addf %8, %14 : vector<32x256xf32>
    %cst_8 = arith.constant 0.797884583 : f32
    %16 = vector.broadcast %cst_8 : f32 to vector<32x256xf32>
    %17 = arith.mulf %16, %15 : vector<32x256xf32>
    %18 = math.tanh %17 : vector<32x256xf32>
    %cst_9 = arith.constant 1.000000e+00 : f32
    %19 = vector.broadcast %cst_9 : f32 to vector<32x256xf32>
    %20 = arith.addf %19, %18 : vector<32x256xf32>
    %21 = arith.mulf %10, %20 : vector<32x256xf32>
    %22 = arith.truncf %21 : vector<32x256xf32> to vector<32x256xbf16>
    %c0_10 = arith.constant 0 : index
    %c0_11 = arith.constant 0 : index
    %23 = vector.load %arg7[%c0_10, %c0_11] : memref<32x256xbf16, #tpu.memory_space<vmem>>, vector<32x256xbf16>
    tpu.vector_store %arg7[%c0_10, %c0_11], %22 {strides = array<i32>} : memref<32x256xbf16, #tpu.memory_space<vmem>>, vector<32x256xbf16>,
    return
  }
  func.func @transform_0(%arg0: i32, %arg1: i32) -> (i32, i32) {
    %c0_i32 = arith.constant 0 : i32
    %c0_i32_0 = arith.constant 0 : i32
    return %arg0, %c0_i32 : i32, i32
  }
  func.func @transform_1(%arg0: i32, %arg1: i32) -> (i32, i32) {
    %c0_i32 = arith.constant 0 : i32
    %c0_i32_0 = arith.constant 0 : i32
    %c0_i32_1 = arith.constant 0 : i32
    return %c0_i32, %c0_i32_0 : i32, i32
  }
  func.func @transform_2(%arg0: i32, %arg1: i32) -> (i32, i32) {
    %c0_i32 = arith.constant 0 : i32
    %c0_i32_0 = arith.constant 0 : i32
    %c0_i32_1 = arith.constant 0 : i32
    return %c0_i32, %c0_i32_0 : i32, i32
  }
  func.func @transform_3(%arg0: i32, %arg1: i32) -> (i32, i32) {
    %c0_i32 = arith.constant 0 : i32
    %c0_i32_0 = arith.constant 0 : i32
    return %c0_i32, %arg1 : i32, i32
  }
  func.func @transform_4(%arg0: i32, %arg1: i32) -> (i32, i32) {
    %c0_i32 = arith.constant 0 : i32
    %c0_i32_0 = arith.constant 0 : i32
    return %c0_i32, %arg1 : i32, i32
  }
  func.func @transform_5(%arg0: i32, %arg1: i32) -> (i32, i32) {
    %c0_i32 = arith.constant 0 : i32
    return %arg0, %arg1 : i32, i32
  }
}

module attributes {stable_mosaic.version = 11 : i64} {
  func.func @_ln_linear_kernel(%arg0: i32, %arg1: i32, %arg2: memref<32x128xf32, #tpu.memory_space<vmem>>, %arg3: memref<1x128xf32, #tpu.memory_space<vmem>>, %arg4: memref<1x128xf32, #tpu.memory_space<vmem>>, %arg5: memref<128x128xbf16, #tpu.memory_space<vmem>>, %arg6: memref<1x128xf32, #tpu.memory_space<vmem>>, %arg7: memref<32x128xbf16, #tpu.memory_space<vmem>>, %arg8: memref<32x128xbf16, #tpu.memory_space<vmem>>) attributes {dimension_semantics = [#tpu.dimension_semantics<parallel>, #tpu.dimension_semantics<arbitrary>], iteration_bounds = array<i64: 1, 3>, scalar_prefetch = 0 : i64, scratch_operands = 1 : i64, tpu.core_type = #tpu.core_type<tc>, window_params = [{transform_indices = @transform_0, window_bounds = array<i64: 32, 128>}, {pipeline_mode = #tpu.pipeline_mode<synchronous>, transform_indices = @transform_1, window_bounds = array<i64: 1, 128>}, {pipeline_mode = #tpu.pipeline_mode<synchronous>, transform_indices = @transform_2, window_bounds = array<i64: 1, 128>}, {transform_indices = @transform_3, window_bounds = array<i64: 128, 128>}, {transform_indices = @transform_4, window_bounds = array<i64: 1, 128>}, {transform_indices = @transform_5, window_bounds = array<i64: 32, 128>}]} {
    %c0_i32 = arith.constant 0 : i32
    %0 = arith.cmpi eq, %arg1, %c0_i32 : i32
    %1 = arith.extui %0 : i1 to i32
    %c0_i32_0 = arith.constant 0 : i32
    %2 = arith.cmpi ne, %1, %c0_i32_0 : i32
    scf.if %2 {
      %c0_8 = arith.constant 0 : index
      %c0_9 = arith.constant 0 : index
      %11 = vector.load %arg2[%c0_8, %c0_9] : memref<32x128xf32, #tpu.memory_space<vmem>>, vector<32x128xf32>
      %cst_10 = arith.constant dense<0.000000e+00> : vector<32xf32>
      %12 = vector.multi_reduction <add>, %11, %cst_10 [1] : vector<32x128xf32> to vector<32xf32>
      %13 = vector.shape_cast %12 : vector<32xf32> to vector<32x1xf32>
      %cst_11 = arith.constant 1.280000e+02 : f32
      %14 = vector.broadcast %cst_11 : f32 to vector<32x1xf32>
      %15 = arith.divf %13, %14 : vector<32x1xf32>
      %16 = vector.broadcast %15 : vector<32x1xf32> to vector<32x128xf32>
      %17 = arith.subf %11, %16 : vector<32x128xf32>
      %18 = arith.mulf %17, %17 : vector<32x128xf32>
      %cst_12 = arith.constant dense<0.000000e+00> : vector<32xf32>
      %19 = vector.multi_reduction <add>, %18, %cst_12 [1] : vector<32x128xf32> to vector<32xf32>
      %20 = vector.shape_cast %19 : vector<32xf32> to vector<32x1xf32>
      %cst_13 = arith.constant 1.280000e+02 : f32
      %21 = vector.broadcast %cst_13 : f32 to vector<32x1xf32>
      %22 = arith.divf %20, %21 : vector<32x1xf32>
      %cst_14 = arith.constant 9.99999974E-6 : f32
      %23 = vector.broadcast %cst_14 : f32 to vector<32x1xf32>
      %24 = arith.addf %22, %23 : vector<32x1xf32>
      %25 = math.rsqrt %24 : vector<32x1xf32>
      %26 = vector.broadcast %25 : vector<32x1xf32> to vector<32x128xf32>
      %27 = arith.mulf %17, %26 : vector<32x128xf32>
      %c0_15 = arith.constant 0 : index
      %c0_16 = arith.constant 0 : index
      %28 = vector.load %arg3[%c0_15, %c0_16] : memref<1x128xf32, #tpu.memory_space<vmem>>, vector<1x128xf32>
      %29 = vector.broadcast %28 : vector<1x128xf32> to vector<32x128xf32>
      %30 = arith.mulf %27, %29 : vector<32x128xf32>
      %c0_17 = arith.constant 0 : index
      %c0_18 = arith.constant 0 : index
      %31 = vector.load %arg4[%c0_17, %c0_18] : memref<1x128xf32, #tpu.memory_space<vmem>>, vector<1x128xf32>
      %32 = vector.broadcast %31 : vector<1x128xf32> to vector<32x128xf32>
      %33 = arith.addf %30, %32 : vector<32x128xf32>
      %34 = arith.truncf %33 : vector<32x128xf32> to vector<32x128xbf16>
      %c0_19 = arith.constant 0 : index
      %c0_20 = arith.constant 0 : index
      %35 = vector.load %arg8[%c0_19, %c0_20] : memref<32x128xbf16, #tpu.memory_space<vmem>>, vector<32x128xbf16>
      tpu.vector_store %arg8[%c0_19, %c0_20], %34 {strides = array<i32>} : memref<32x128xbf16, #tpu.memory_space<vmem>>, vector<32x128xbf16>,
    } else {
    }
    %c0 = arith.constant 0 : index
    %c0_1 = arith.constant 0 : index
    %3 = vector.load %arg8[%c0, %c0_1] : memref<32x128xbf16, #tpu.memory_space<vmem>>, vector<32x128xbf16>
    %c0_2 = arith.constant 0 : index
    %c0_3 = arith.constant 0 : index
    %4 = vector.load %arg5[%c0_2, %c0_3] : memref<128x128xbf16, #tpu.memory_space<vmem>>, vector<128x128xbf16>
    %cst = arith.constant dense<0.000000e+00> : vector<32x128xf32>
    %5 = tpu.matmul %3, %4, %cst {dimension_numbers = #tpu.dot_dimension_numbers<[1], [0], [0], [1], [0, 0, 1, 1], [], []>} : vector<32x128xbf16>, vector<128x128xbf16>, vector<32x128xf32> -> vector<32x128xf32>
    %c0_4 = arith.constant 0 : index
    %c0_5 = arith.constant 0 : index
    %6 = vector.load %arg6[%c0_4, %c0_5] : memref<1x128xf32, #tpu.memory_space<vmem>>, vector<1x128xf32>
    %7 = vector.broadcast %6 : vector<1x128xf32> to vector<32x128xf32>
    %8 = arith.addf %5, %7 : vector<32x128xf32>
    %9 = arith.truncf %8 : vector<32x128xf32> to vector<32x128xbf16>
    %c0_6 = arith.constant 0 : index
    %c0_7 = arith.constant 0 : index
    %10 = vector.load %arg7[%c0_6, %c0_7] : memref<32x128xbf16, #tpu.memory_space<vmem>>, vector<32x128xbf16>
    tpu.vector_store %arg7[%c0_6, %c0_7], %9 {strides = array<i32>} : memref<32x128xbf16, #tpu.memory_space<vmem>>, vector<32x128xbf16>,
    return
  }
  func.func @transform_0(%arg0: i32, %arg1: i32) -> (i32, i32) {
    %c0_i32 = arith.constant 0 : i32
    %c0_i32_0 = arith.constant 0 : i32
    return %arg0, %c0_i32 : i32, i32
  }
  func.func @transform_1(%arg0: i32, %arg1: i32) -> (i32, i32) {
    %c0_i32 = arith.constant 0 : i32
    %c0_i32_0 = arith.constant 0 : i32
    %c0_i32_1 = arith.constant 0 : i32
    return %c0_i32, %c0_i32_0 : i32, i32
  }
  func.func @transform_2(%arg0: i32, %arg1: i32) -> (i32, i32) {
    %c0_i32 = arith.constant 0 : i32
    %c0_i32_0 = arith.constant 0 : i32
    %c0_i32_1 = arith.constant 0 : i32
    return %c0_i32, %c0_i32_0 : i32, i32
  }
  func.func @transform_3(%arg0: i32, %arg1: i32) -> (i32, i32) {
    %c0_i32 = arith.constant 0 : i32
    %c0_i32_0 = arith.constant 0 : i32
    return %c0_i32, %arg1 : i32, i32
  }
  func.func @transform_4(%arg0: i32, %arg1: i32) -> (i32, i32) {
    %c0_i32 = arith.constant 0 : i32
    %c0_i32_0 = arith.constant 0 : i32
    return %c0_i32, %arg1 : i32, i32
  }
  func.func @transform_5(%arg0: i32, %arg1: i32) -> (i32, i32) {
    %c0_i32 = arith.constant 0 : i32
    return %arg0, %arg1 : i32, i32
  }
}

module attributes {stable_mosaic.version = 11 : i64} {
  func.func @_attn_kernel(%arg0: i32, %arg1: i32, %arg2: i32, %arg3: memref<16x128xbf16, #tpu.memory_space<vmem>>, %arg4: memref<16x128xbf16, #tpu.memory_space<vmem>>, %arg5: memref<16x128xbf16, #tpu.memory_space<vmem>>, %arg6: memref<16x128xbf16, #tpu.memory_space<vmem>>) attributes {dimension_semantics = [#tpu.dimension_semantics<parallel>, #tpu.dimension_semantics<parallel>, #tpu.dimension_semantics<parallel>], iteration_bounds = array<i64: 2, 1, 1>, scalar_prefetch = 0 : i64, scratch_operands = 0 : i64, tpu.core_type = #tpu.core_type<tc>, window_params = [{transform_indices = @transform_0, window_bounds = array<i64: 16, 128>}, {transform_indices = @transform_1, window_bounds = array<i64: 16, 128>}, {transform_indices = @transform_2, window_bounds = array<i64: 16, 128>}, {transform_indices = @transform_3, window_bounds = array<i64: 16, 128>}]} {
    %c0 = arith.constant 0 : index
    %c0_0 = arith.constant 0 : index
    %0 = vector.load %arg3[%c0, %c0_0] : memref<16x128xbf16, #tpu.memory_space<vmem>>, vector<16x128xbf16>
    %c0_1 = arith.constant 0 : index
    %c0_2 = arith.constant 0 : index
    %1 = vector.load %arg4[%c0_1, %c0_2] : memref<16x128xbf16, #tpu.memory_space<vmem>>, vector<16x128xbf16>
    %c0_3 = arith.constant 0 : index
    %c0_4 = arith.constant 0 : index
    %2 = vector.load %arg5[%c0_3, %c0_4] : memref<16x128xbf16, #tpu.memory_space<vmem>>, vector<16x128xbf16>
    %3 = vector.extract_strided_slice %0 {offsets = [0, 0], sizes = [16, 64], strides = [1, 1]} : vector<16x128xbf16> to vector<16x64xbf16>
    %4 = vector.extract_strided_slice %1 {offsets = [0, 0], sizes = [16, 64], strides = [1, 1]} : vector<16x128xbf16> to vector<16x64xbf16>
    %5 = vector.extract_strided_slice %2 {offsets = [0, 0], sizes = [16, 64], strides = [1, 1]} : vector<16x128xbf16> to vector<16x64xbf16>
    %cst = arith.constant dense<0.000000e+00> : vector<16x16xf32>
    %6 = tpu.matmul %3, %4, %cst {dimension_numbers = #tpu.dot_dimension_numbers<[1], [1], [0], [0], [0, 0, 1, 0], [], []>} : vector<16x64xbf16>, vector<16x64xbf16>, vector<16x16xf32> -> vector<16x16xf32>
    %cst_5 = arith.constant 1.250000e-01 : f32
    %7 = vector.broadcast %cst_5 : f32 to vector<16x16xf32>
    %8 = arith.mulf %6, %7 : vector<16x16xf32>
    %cst_6 = arith.constant dense<0xFF800000> : vector<16xf32>
    %9 = vector.multi_reduction <maximumf>, %8, %cst_6 [1] : vector<16x16xf32> to vector<16xf32>
    %10 = vector.shape_cast %9 : vector<16xf32> to vector<16x1xf32>
    %11 = vector.broadcast %10 : vector<16x1xf32> to vector<16x16xf32>
    %12 = arith.subf %8, %11 : vector<16x16xf32>
    %13 = math.exp %12 : vector<16x16xf32>
    %cst_7 = arith.constant dense<0.000000e+00> : vector<16xf32>
    %14 = vector.multi_reduction <add>, %13, %cst_7 [1] : vector<16x16xf32> to vector<16xf32>
    %15 = vector.shape_cast %14 : vector<16xf32> to vector<16x1xf32>
    %16 = arith.truncf %13 : vector<16x16xf32> to vector<16x16xbf16>
    %cst_8 = arith.constant dense<0.000000e+00> : vector<16x64xf32>
    %17 = tpu.matmul %16, %5, %cst_8 {dimension_numbers = #tpu.dot_dimension_numbers<[1], [0], [0], [1], [0, 0, 1, 1], [], []>} : vector<16x16xbf16>, vector<16x64xbf16>, vector<16x64xf32> -> vector<16x64xf32>
    %18 = vector.broadcast %15 : vector<16x1xf32> to vector<16x64xf32>
    %19 = arith.divf %17, %18 : vector<16x64xf32>
    %20 = vector.extract_strided_slice %0 {offsets = [0, 64], sizes = [16, 64], strides = [1, 1]} : vector<16x128xbf16> to vector<16x64xbf16>
    %21 = vector.extract_strided_slice %1 {offsets = [0, 64], sizes = [16, 64], strides = [1, 1]} : vector<16x128xbf16> to vector<16x64xbf16>
    %22 = vector.extract_strided_slice %2 {offsets = [0, 64], sizes = [16, 64], strides = [1, 1]} : vector<16x128xbf16> to vector<16x64xbf16>
    %cst_9 = arith.constant dense<0.000000e+00> : vector<16x16xf32>
    %23 = tpu.matmul %20, %21, %cst_9 {dimension_numbers = #tpu.dot_dimension_numbers<[1], [1], [0], [0], [0, 0, 1, 0], [], []>} : vector<16x64xbf16>, vector<16x64xbf16>, vector<16x16xf32> -> vector<16x16xf32>
    %cst_10 = arith.constant 1.250000e-01 : f32
    %24 = vector.broadcast %cst_10 : f32 to vector<16x16xf32>
    %25 = arith.mulf %23, %24 : vector<16x16xf32>
    %cst_11 = arith.constant dense<0xFF800000> : vector<16xf32>
    %26 = vector.multi_reduction <maximumf>, %25, %cst_11 [1] : vector<16x16xf32> to vector<16xf32>
    %27 = vector.shape_cast %26 : vector<16xf32> to vector<16x1xf32>
    %28 = vector.broadcast %27 : vector<16x1xf32> to vector<16x16xf32>
    %29 = arith.subf %25, %28 : vector<16x16xf32>
    %30 = math.exp %29 : vector<16x16xf32>
    %cst_12 = arith.constant dense<0.000000e+00> : vector<16xf32>
    %31 = vector.multi_reduction <add>, %30, %cst_12 [1] : vector<16x16xf32> to vector<16xf32>
    %32 = vector.shape_cast %31 : vector<16xf32> to vector<16x1xf32>
    %33 = arith.truncf %30 : vector<16x16xf32> to vector<16x16xbf16>
    %cst_13 = arith.constant dense<0.000000e+00> : vector<16x64xf32>
    %34 = tpu.matmul %33, %22, %cst_13 {dimension_numbers = #tpu.dot_dimension_numbers<[1], [0], [0], [1], [0, 0, 1, 1], [], []>} : vector<16x16xbf16>, vector<16x64xbf16>, vector<16x64xf32> -> vector<16x64xf32>
    %35 = vector.broadcast %32 : vector<16x1xf32> to vector<16x64xf32>
    %36 = arith.divf %34, %35 : vector<16x64xf32>
    %37 = tpu.concatenate %19, %36 in 1 : vector<16x64xf32>, vector<16x64xf32> -> vector<16x128xf32>
    %38 = arith.truncf %37 : vector<16x128xf32> to vector<16x128xbf16>
    %c0_14 = arith.constant 0 : index
    %c0_15 = arith.constant 0 : index
    %39 = vector.load %arg6[%c0_14, %c0_15] : memref<16x128xbf16, #tpu.memory_space<vmem>>, vector<16x128xbf16>
    tpu.vector_store %arg6[%c0_14, %c0_15], %38 {strides = array<i32>} : memref<16x128xbf16, #tpu.memory_space<vmem>>, vector<16x128xbf16>,
    return
  }
  func.func @transform_0(%arg0: i32, %arg1: i32, %arg2: i32) -> (i32, i32) {
    %c1_i32 = arith.constant 1 : i32
    %0 = arith.muli %arg0, %c1_i32 : i32
    %1 = arith.addi %0, %arg2 : i32
    %c0_i32 = arith.constant 0 : i32
    return %1, %arg1 : i32, i32
  }
  func.func @transform_1(%arg0: i32, %arg1: i32, %arg2: i32) -> (i32, i32) {
    %c1_i32 = arith.constant 1 : i32
    %0 = arith.addi %c1_i32, %arg1 : i32
    %c0_i32 = arith.constant 0 : i32
    return %arg0, %0 : i32, i32
  }
  func.func @transform_2(%arg0: i32, %arg1: i32, %arg2: i32) -> (i32, i32) {
    %c2_i32 = arith.constant 2 : i32
    %0 = arith.addi %c2_i32, %arg1 : i32
    %c0_i32 = arith.constant 0 : i32
    return %arg0, %0 : i32, i32
  }
  func.func @transform_3(%arg0: i32, %arg1: i32, %arg2: i32) -> (i32, i32) {
    %c1_i32 = arith.constant 1 : i32
    %0 = arith.muli %arg0, %c1_i32 : i32
    %1 = arith.addi %0, %arg2 : i32
    %c0_i32 = arith.constant 0 : i32
    return %1, %arg1 : i32, i32
  }
}

module attributes {stable_mosaic.version = 11 : i64} {
  func.func @_linear_res_kernel(%arg0: i32, %arg1: i32, %arg2: memref<32x256xbf16, #tpu.memory_space<vmem>>, %arg3: memref<256x128xbf16, #tpu.memory_space<vmem>>, %arg4: memref<1x128xf32, #tpu.memory_space<vmem>>, %arg5: memref<32x128xf32, #tpu.memory_space<vmem>>, %arg6: memref<32x128xf32, #tpu.memory_space<vmem>>) attributes {dimension_semantics = [#tpu.dimension_semantics<parallel>, #tpu.dimension_semantics<parallel>], iteration_bounds = array<i64: 1, 1>, scalar_prefetch = 0 : i64, scratch_operands = 0 : i64, tpu.core_type = #tpu.core_type<tc>, window_params = [{transform_indices = @transform_0, window_bounds = array<i64: 32, 256>}, {transform_indices = @transform_1, window_bounds = array<i64: 256, 128>}, {transform_indices = @transform_2, window_bounds = array<i64: 1, 128>}, {transform_indices = @transform_3, window_bounds = array<i64: 32, 128>}, {transform_indices = @transform_4, window_bounds = array<i64: 32, 128>}]} {
    %c0 = arith.constant 0 : index
    %c0_0 = arith.constant 0 : index
    %0 = vector.load %arg2[%c0, %c0_0] : memref<32x256xbf16, #tpu.memory_space<vmem>>, vector<32x256xbf16>
    %c0_1 = arith.constant 0 : index
    %c0_2 = arith.constant 0 : index
    %1 = vector.load %arg3[%c0_1, %c0_2] : memref<256x128xbf16, #tpu.memory_space<vmem>>, vector<256x128xbf16>
    %cst = arith.constant dense<0.000000e+00> : vector<32x128xf32>
    %2 = tpu.matmul %0, %1, %cst {dimension_numbers = #tpu.dot_dimension_numbers<[1], [0], [0], [1], [0, 0, 1, 1], [], []>} : vector<32x256xbf16>, vector<256x128xbf16>, vector<32x128xf32> -> vector<32x128xf32>
    %c0_3 = arith.constant 0 : index
    %c0_4 = arith.constant 0 : index
    %3 = vector.load %arg4[%c0_3, %c0_4] : memref<1x128xf32, #tpu.memory_space<vmem>>, vector<1x128xf32>
    %4 = vector.broadcast %3 : vector<1x128xf32> to vector<32x128xf32>
    %5 = arith.addf %2, %4 : vector<32x128xf32>
    %c0_5 = arith.constant 0 : index
    %c0_6 = arith.constant 0 : index
    %6 = vector.load %arg5[%c0_5, %c0_6] : memref<32x128xf32, #tpu.memory_space<vmem>>, vector<32x128xf32>
    %7 = arith.addf %5, %6 : vector<32x128xf32>
    %c0_7 = arith.constant 0 : index
    %c0_8 = arith.constant 0 : index
    %8 = vector.load %arg6[%c0_7, %c0_8] : memref<32x128xf32, #tpu.memory_space<vmem>>, vector<32x128xf32>
    tpu.vector_store %arg6[%c0_7, %c0_8], %7 {strides = array<i32>} : memref<32x128xf32, #tpu.memory_space<vmem>>, vector<32x128xf32>,
    return
  }
  func.func @transform_0(%arg0: i32, %arg1: i32) -> (i32, i32) {
    %c0_i32 = arith.constant 0 : i32
    %c0_i32_0 = arith.constant 0 : i32
    return %arg0, %c0_i32 : i32, i32
  }
  func.func @transform_1(%arg0: i32, %arg1: i32) -> (i32, i32) {
    %c0_i32 = arith.constant 0 : i32
    %c0_i32_0 = arith.constant 0 : i32
    return %c0_i32, %arg1 : i32, i32
  }
  func.func @transform_2(%arg0: i32, %arg1: i32) -> (i32, i32) {
    %c0_i32 = arith.constant 0 : i32
    %c0_i32_0 = arith.constant 0 : i32
    return %c0_i32, %arg1 : i32, i32
  }
  func.func @transform_3(%arg0: i32, %arg1: i32) -> (i32, i32) {
    %c0_i32 = arith.constant 0 : i32
    return %arg0, %arg1 : i32, i32
  }
  func.func @transform_4(%arg0: i32, %arg1: i32) -> (i32, i32) {
    %c0_i32 = arith.constant 0 : i32
    return %arg0, %arg1 : i32, i32
  }
}

</mosaic_0001>

<bundles_post_ra>
// kernel: transformer_encoder_block.7
= control target key start
LH: loop header
LB: loop body
LE: loop exit
PB: predicated region body
PF: predicated region fallthrough
CT: control target
= control target key end

     0   :  { %s277_s1 = inlined_call_operand.vmem [shape: bf16[128,128], index: 1, kind: input, shape index: {}]   ;;  %s278_s2 = inlined_call_operand.vmem [shape: f32[1,128], index: 2, kind: input, shape index: {}]   ;;  %s279_s0 = inlined_call_operand.vmem [shape: bf16[32,128], index: 0, kind: input, shape index: {}]   ;;  %s280_s3 = inlined_call_operand.vmem [shape: f32[32,128], index: 3, kind: input, shape index: {}]   ;;  %s281_s4 = inlined_call_operand.vmem [shape: f32[32,128], index: 4, kind: output, shape index: {}]  }
   0x1   :  { %v185_v0 = vld [vmem:[%s277_s1 + $0x38] sm:$0xff]  ;;  %v184_v1 = vld [vmem:[%s277_s1 + $0x30] sm:$0xff]  ;;  %v183_v2 = vld [vmem:[%s277_s1 + $0x28] sm:$0xff] }
   0x2   :  { %101 = vmatpush.bf16.msra.mxu0 %v185_v0  ;;  %186 = vmatpush.bf16.msra.mxu1 %v185_v0  ;;  %v182_v3 = vld [vmem:[%s277_s1 + $0x20] sm:$0xff]  ;;  %v181_v4 = vld [vmem:[%s277_s1 + $0x18] sm:$0xff]  ;;  %v180_v5 = vld [vmem:[%s277_s1 + $0x10] sm:$0xff] }
   0x3   :  { %v179_v6 = vld [vmem:[%s277_s1 + $0x8] sm:$0xff]  ;;  %v178_v7 = vld [vmem:[%s277_s1] sm:$0xff]  ;;  %v122_v14 = vld [vmem:[%s280_s3 + $0x10] sm:$0xff] }
   0x4   :  { %v176_v8 = vld [vmem:[%s279_s0] sm:$0xff]  ;;  %v177_v9 = vld [vmem:[%s279_s0 + $0x8] sm:$0xff]  ;;  %v123_v22 = vld [vmem:[%s280_s3 + $0x18] sm:$0xff] }
   0x5   :  { %v194_v10 = vld [vmem:[%s278_s2] ss:$0 sm:$0xff]  ;;  %v121_v20 = vld [vmem:[%s280_s3 + $0x8] sm:$0xff] }
   0x6   :  { %102 = vmatpush.bf16.msra.mxu0 %v184_v1  ;;  %187 = vmatpush.bf16.msra.mxu1 %v184_v1  ;;  %v120_v12 = vld [vmem:[%s280_s3] sm:$0xff] }
   0xa   :  { %103 = vmatpush.bf16.msra.mxu0 %v183_v2  ;;  %188 = vmatpush.bf16.msra.mxu1 %v183_v2 }
   0xe   :  { %104 = vmatpush.bf16.msra.mxu0 %v182_v3  ;;  %189 = vmatpush.bf16.msra.mxu1 %v182_v3 }
  0x12   :  { %105 = vmatpush.bf16.msra.mxu0 %v181_v4  ;;  %190 = vmatpush.bf16.msra.mxu1 %v181_v4 }
  0x16   :  { %106 = vmatpush.bf16.msra.mxu0 %v180_v5  ;;  %191 = vmatpush.bf16.msra.mxu1 %v180_v5 }
  0x1a   :  { %107 = vmatpush.bf16.msra.mxu0 %v179_v6  ;;  %192 = vmatpush.bf16.msra.mxu1 %v179_v6 }
  0x1e   :  { %108 = vmatpush.bf16.msra.mxu0 %v178_v7  ;;  %193 = vmatpush.bf16.msra.mxu1 %v178_v7 }
  0x21   :  { %109 = vmatmul.bf16.vlgmr.msra.gmra.mxu0 %v176_v8  ;;  %114 = vmatmul.bf16.vlgmr.msra.gmra.mxu1 %v177_v9 }
  0x9e   :  { %v110_v11 = vpop.f32.mrf.mxu0  ;;  %v115_v13 = vpop.f32.mrf.mxu1 }
  0x9f   :  { %v111_v15 = vadd.f32 %v194_v10, %v110_v11  ;;  %v116_v16 = vadd.f32 %v194_v10, %v115_v13 }
  0xa1   :  { %v124_v17 = vadd.f32 %v120_v12, %v111_v15  ;;  %v126_v18 = vadd.f32 %v122_v14, %v116_v16 }
  0xa3   :  { %128 = vst [vmem:[%s281_s4] sm:$0xff] %v124_v17 }
  0xa4   :  { %130 = vst [vmem:[%s281_s4 + $0x10] sm:$0xff] %v126_v18 }
  0xa6   :  { %v112_v19 = vpop.f32.mrf.mxu0  ;;  %v117_v21 = vpop.f32.mrf.mxu1 }
  0xa7   :  { %v113_v23 = vadd.f32 %v194_v10, %v112_v19  ;;  %v118_v24 = vadd.f32 %v194_v10, %v117_v21 }
  0xa9   :  { %v125_v25 = vadd.f32 %v121_v20, %v113_v23  ;;  %v127_v26 = vadd.f32 %v123_v22, %v118_v24 }
  0xab   :  { %129 = vst [vmem:[%s281_s4 + $0x8] sm:$0xff] %v125_v25 }
  0xac   :  { %131 = vst [vmem:[%s281_s4 + $0x18] sm:$0xff] %v127_v26 }

// kernel: transformer_encoder_block.5
= control target key start
LH: loop header
LB: loop body
LE: loop exit
PB: predicated region body
PF: predicated region fallthrough
CT: control target
= control target key end

     0   :  { %s1201_s0 = inlined_call_operand.hbm [shape: f32[32,128], index: 0, kind: input, shape index: {}]   ;;  %s1202_s1 = inlined_call_operand.vmem [shape: f32[1,128], index: 1, kind: input, shape index: {}]   ;;  %s1203_s2 = inlined_call_operand.vmem [shape: f32[1,128], index: 2, kind: input, shape index: {}]   ;;  %s1204_s3 = inlined_call_operand.hbm [shape: bf16[128,384], index: 3, kind: input, shape index: {}]   ;;  %s1205_s4 = inlined_call_operand.vmem [shape: f32[1,384], index: 4, kind: input, shape index: {}]   ;;  %s1206_s5 = inlined_call_operand.vmem [shape: bf16[32,384], index: 5, kind: output, shape index: {}]  }
   0x1   :  { %1207 = sst [smem:[#allocation10_spill]] %s1201_s0 }
   0x2   :  { %10 = vsyncpa [#allocation4], 0 }
   0x3   :  { %11 = vsyncpa [#allocation6], 0 }
   0x4   :  { %13 = vsyncpa [#allocation6 + $0x1], 0  ;;  %s1019_s18 = smov 0   ;;  %s1021_s19 = smov 0  }
   0x5   :  { %s1023_s20 = smov 0   ;;  %s1025_s21 = smov 0  }
   0x6   :  { %s1027_s22 = smov 0   ;;  %s1029_s23 = smov 0  }
   0x7 LB: > { %s685_s24 = sadd.s32 4294967295, %s980_s23   ;;  %p119_p0 = scmp.ne.s32.totalorder %s964_s19, %s960_s18  ;;  %s980_s23 = sphi %s1029_s23, %s19_s23   ;;  %s976_s22 = sphi %s1027_s22, %s1219_s22   ;;  %s972_s21 = sphi %s1025_s21, %s1218_s21   ;;  %s968_s20 = sphi %s1023_s20, %s1217_s20   ;;  %s964_s19 = sphi %s1021_s19, %s1216_s19   ;;  %s960_s18 = sphi %s1019_s18, %s1215_s18  }
   0x8   : > { %p1049_p1 = scmp.eq.s32.totalorder %s685_s24, 0  ;;  %p1053_p2 = scmp.eq.s32.totalorder %s685_s24, 2 }
   0x9   : > { %p687_p3 = scmp.ge.s32.totalorder %s980_s23, 1  ;;  %p184_p4 = scmp.lt.s32.totalorder %s980_s23, 4 }
   0xa   : > { %p1061_p5 = por %p1049_p1, %p119_p0  ;;  %s1212_s0 = sld [smem:[#allocation10_spill]] }
   0xb   : > { %p1065_p6 = pnand %p687_p3, %p184_p4  ;;  %s982_s7 = smov [#allocation3]  }
   0xc   : > { %s200_s8 = sshll.u32 %s982_s7, 4  ;;  %s983_s9 = smov 128   ;;  %s201_s8 = int_to_ptr.vmem [resolvable:$true] %s200_s8 }
   0xd   : > { %p787_p7 = pneg %p1065_p6  ;;  %s984_s10 = smov 8  }
   0xe   : > { %s28_s11 = sadd.s32 1, %s976_s22  ;;  %s106_s12 = sadd.s32 1, %s968_s20 }
   0xf   : > { %p788_p8 = pnand %p787_p7, %p1049_p1  ;;  %p29_p9 = scmp.ge.s32.totalorder %s28_s11, 3 }
  0x10   : > { %s198_s6 = sshll.u32 %s1212_s0, 4  ;;  %p113_p10 = scmp.ne.s32.totalorder %s968_s20, %s964_s19  ;;  %s199_s6 = int_to_ptr.hbm [resolvable:$true] %s198_s6 }
  0x11   : > { %790 = dma.hbm_to_vmem [thread:$0]  (!%p788_p8), %s199_s6, 512, %s201_s8, [#allocation4], %s983_s9, %s983_s9, %s984_s10  }
  0x12   : > { %p114_p11 = scmp.eq.s32.totalorder %s980_s23, 0  ;;  %p796_p12 = scmp.lt.s32.totalorder %s980_s23, 3 }
  0x13   : > { %s1221_s11 = smov (%p29_p9, %s28_s11), 0  ;;  %p1090_p0 = por %p1053_p2, %p113_p10 }
  0x14   : > { %p1084_p13 = por %p114_p11, %p113_p10  ;;  %s103_s15 = ssub.s32 %s976_s22, %s1221_s11 }
  0x15   : > { %s220_s16 = sand.u32 1, %s968_s20   ;;  %p104_p3 = scmp.eq.s32.totalorder %s103_s15, 0 }
  0x16   : > { %s690_s17 = sshll.u32 %s220_s16, 6  ;;  %s691_s18 = sshll.u32 %s976_s22, 2 }
  0x17   : > { %s1099_s24 = scalar_select %p104_p3, %s968_s20, %s106_s12  }
  0x18   : > { %s228_s6 = scalar_lea.hbm %s1204_s3, %s691_s18  ;;  %s224_s8 = scalar_lea.vmem [#allocation5], %s690_s17 }
  0x19   : > { %s229_s7 = sshll.u32 %s228_s6, 4  ;;  %s231_s9 = sshll.u32 %s224_s8, 4  ;;  %s230_s7 = int_to_ptr.hbm [resolvable:$true] %s229_s7  ;;  %s232_s9 = int_to_ptr.vmem [resolvable:$true] %s231_s9 }
  0x1a   : > { %p792_p2 = pnand %p796_p12, %p1084_p13  ;;  %s221_s26 = scalar_lea.sflag [#allocation6], %s220_s16 }
  0x1b   : > { %s985_s10 = smov 192   ;;  %s986_s0 = smov 64  }
  0x1c   : > { %s987_s15 = smov 4   ;;  %249 = sbr.rel (%p1065_p6) target bundleno = 507 (0x1fb), region = 40 }
  0x1d   : > { %794 = dma.hbm_to_vmem [thread:$0]  (!%p792_p2), %s230_s7, 1024, %s232_s9, %s221_s26, %s985_s10, %s986_s0, %s987_s15  }
  0x21   : > { %951 = dma.done.wait (%p1049_p1), [#allocation4], 512  }
  0x22   : > { %953 = vsyncadd (%p1049_p1), [#allocation4], 4294966784  ;;  %s256_s12 = sand.u32 1, %s964_s19  }
  0x23   : > { %s694_s13 = sshll.u32 %s256_s12, 6  ;;  %s257_s17 = scalar_lea.sflag [#allocation6], %s256_s12 }
  0x24   : > { %s1115_s18 = scalar_lea.vmem [#allocation5], %s694_s13 }
  0x25   : > { %955 = dma.done.wait (%p1061_p5), %s257_s17, 1024  }
  0x26   : > { %957 = vsyncadd (%p1061_p5), %s257_s17, 4294966272  ;;  %s695_s0 = sshll.u32 %s256_s12, 4  ;;  %p291_p4 = scmp.lt.s32.totalorder %s972_s21, 2 }
  0x27   : > { %s1129_s30 = scalar_lea.vmem [#allocation7], %s695_s0  ;;  %p696_p1 = scmp.ne.s32.totalorder %s972_s21, 0 }
  0x28   : > { %s1123_s28 = scalar_select %p291_p4, %s972_s21, 2 }
  0x29   : > { %298 = sbr.rel (%p696_p1) target bundleno = 325 (0x145), region = 52 }
  0x2a   : > { %s293_s29 = scalar_lea.vmem %s1205_s4, %s1123_s28 }
  0x2e   : > { %v301_v0 = vld [vmem:[#allocation3 + $0x10] sm:$0xff]  ;;  %v299_v1 = vld [vmem:[#allocation3] sm:$0xff]  ;;  %v302_v2 = vld [vmem:[#allocation3 + $0x18] sm:$0xff]  ;;  %v988_v4 = vmov 128.0  }
  0x2f   : > { %307 = vadd.xlane.f32.xlu1 %v301_v0  ;;  %303 = vadd.xlane.f32.xlu0 %v299_v1  ;;  %v300_v3 = vld [vmem:[#allocation3 + $0x8] sm:$0xff]  ;;  %855 = vrcp.f32 %v988_v4  ;;  %v853_v62 = vld [vmem:[%s1202_s1] ss:$0 sm:$0xff] }
  0x35   : > { %v856_v5 = vpop.eup %855 }
  0x36   : > { %v312_v6 = vmul.f32 128.0, %v856_v5  ;;  %vm316_vm0 = vweird.f32 %v856_v5 }
  0x37   : > { %309 = vadd.xlane.f32.xlu1 %v302_v2  ;;  %305 = vadd.xlane.f32.xlu0 %v300_v3 }
  0x38   : > { %v313_v7 = vsub.f32 1.0, %v312_v6 }
  0x3a   : > { %v314_v8 = vmul.f32 %v856_v5, %v313_v7 }
  0x3c   : > { %v315_v9 = vadd.f32 %v856_v5, %v314_v8 }
  0x3e   : > { %v317_v10 = vsel %vm316_vm0, %v856_v5, %v315_v9  ;;  %v854_v5 = vld [vmem:[%s1203_s2] ss:$0 sm:$0xff] }
  0xa2   : > { %v308_v11 = vpop.xlane.xlu1 %307  ;;  %v304_v12 = vpop.xlane.xlu0 %303 }
  0xa3   : > { %v320_v13 = vmul.f32 %v317_v10, %v308_v11  ;;  %v318_v14 = vmul.f32 %v317_v10, %v304_v12 }
  0xa5   : > { %v1132_v15 = vsub.f32 %v301_v0, %v320_v13  ;;  %v1134_v16 = vsub.f32 %v299_v1, %v318_v14 }
  0xa7   : > { %v328_v17 = vmul.f32 %v1132_v15, %v1132_v15  ;;  %v326_v18 = vmul.f32 %v1134_v16, %v1134_v16 }
  0xa9   : > { %334 = vadd.xlane.f32.xlu0 %v328_v17  ;;  %330 = vadd.xlane.f32.xlu2 %v326_v18 }
  0xaa   : > { %v310_v19 = vpop.xlane.xlu1 %309  ;;  %v306_v20 = vpop.xlane.xlu0 %305 }
  0xab   : > { %v321_v21 = vmul.f32 %v317_v10, %v310_v19  ;;  %v319_v22 = vmul.f32 %v317_v10, %v306_v20 }
  0xad   : > { %v1140_v23 = vsub.f32 %v302_v2, %v321_v21  ;;  %v1142_v24 = vsub.f32 %v300_v3, %v319_v22 }
  0xaf   : > { %v329_v25 = vmul.f32 %v1140_v23, %v1140_v23  ;;  %v327_v26 = vmul.f32 %v1142_v24, %v1142_v24 }
  0xb1   : > { %336 = vadd.xlane.f32.xlu1 %v329_v25  ;;  %332 = vadd.xlane.f32.xlu2 %v327_v26 }
 0x11c   : > { %v331_v27 = vpop.xlane.xlu2 %330  ;;  %v335_v28 = vpop.xlane.xlu0 %334 }
 0x11d   : > { %v338_v29 = vmul.f32 %v331_v27, %v317_v10  ;;  %v340_v30 = vmul.f32 %v335_v28, %v317_v10 }
 0x11f   : > { %v342_v31 = vadd.f32 1e-05, %v338_v29  ;;  %v344_v32 = vadd.f32 1e-05, %v340_v30 }
 0x121   : > { %857 = vrsqrt.f32 %v342_v31  ;;  %vm372_vm3 = vweird.f32 %v344_v32  ;;  %vm352_vm4 = vweird.f32 %v342_v31 }
 0x122   : > { %859 = vrsqrt.f32 %v344_v32 }
 0x124   : > { %v337_v33 = vpop.xlane.xlu1 %336  ;;  %v333_v34 = vpop.xlane.xlu2 %332 }
 0x125   : > { %v341_v35 = vmul.f32 %v337_v33, %v317_v10  ;;  %v339_v36 = vmul.f32 %v333_v34, %v317_v10 }
 0x127   : > { %v858_v37 = vpop.eup %857  ;;  %v345_v38 = vadd.f32 1e-05, %v341_v35  ;;  %v343_v39 = vadd.f32 1e-05, %v339_v36 }
 0x128   : > { %v860_v40 = vpop.eup %859  ;;  %v347_v41 = vmul.f32 %v858_v37, %v342_v31  ;;  %vm353_vm2 = vweird.f32 %v858_v37 }
 0x129   : > { %v367_v42 = vmul.f32 %v860_v40, %v344_v32  ;;  %861 = vrsqrt.f32 %v345_v38  ;;  %vm373_vm1 = vweird.f32 %v860_v40  ;;  %vm354_vm6 = vmor %vm352_vm4, %vm353_vm2  ;;  %vm382_vm9 = vweird.f32 %v345_v38 }
 0x12a   : > { %v348_v43 = vmul.f32 %v858_v37, %v347_v41  ;;  %863 = vrsqrt.f32 %v343_v39  ;;  %vm374_vm5 = vmor %vm372_vm3, %vm373_vm1  ;;  %vm362_vm11 = vweird.f32 %v343_v39 }
 0x12b   : > { %v368_v44 = vmul.f32 %v860_v40, %v367_v42 }
 0x12c   : > { %v349_v45 = vmul.f32 0.5, %v348_v43 }
 0x12d   : > { %v369_v46 = vmul.f32 0.5, %v368_v44 }
 0x12e   : > { %v350_v47 = vsub.f32 1.5, %v349_v45 }
 0x12f   : > { %v862_v48 = vpop.eup %861  ;;  %v370_v49 = vsub.f32 1.5, %v369_v46 }
 0x130   : > { %v864_v50 = vpop.eup %863  ;;  %v377_v51 = vmul.f32 %v862_v48, %v345_v38  ;;  %v351_v52 = vmul.f32 %v858_v37, %v350_v47  ;;  %vm383_vm7 = vweird.f32 %v862_v48 }
 0x131   : > { %v371_v53 = vmul.f32 %v860_v40, %v370_v49  ;;  %v357_v54 = vmul.f32 %v864_v50, %v343_v39  ;;  %vm363_vm8 = vweird.f32 %v864_v50  ;;  %vm384_vm10 = vmor %vm382_vm9, %vm383_vm7 }
 0x132   : > { %v378_v55 = vmul.f32 %v862_v48, %v377_v51  ;;  %v355_v59 = vsel %vm354_vm6, %v858_v37, %v351_v52  ;;  %vm364_vm12 = vmor %vm362_vm11, %vm363_vm8 }
 0x133   : > { %v358_v56 = vmul.f32 %v864_v50, %v357_v54  ;;  %v375_v57 = vsel %vm374_vm5, %v860_v40, %v371_v53  ;;  %v386_v1 = vmul.f32 %v355_v59, %v1134_v16 }
 0x134   : > { %v379_v58 = vmul.f32 0.5, %v378_v55  ;;  %v388_v63 = vmul.f32 %v375_v57, %v1132_v15 }
 0x135   : > { %v359_v60 = vmul.f32 0.5, %v358_v56  ;;  %v394_v9 = vmul.f32 %v853_v62, %v386_v1 }
 0x136   : > { %v380_v61 = vsub.f32 1.5, %v379_v58  ;;  %v396_v6 = vmul.f32 %v853_v62, %v388_v63 }
 0x137   : > { %v360_v0 = vsub.f32 1.5, %v359_v60  ;;  %v402_v15 = vadd.f32 %v854_v5, %v394_v9 }
 0x138   : > { %v381_v2 = vmul.f32 %v862_v48, %v380_v61  ;;  %v404_v13 = vadd.f32 %v854_v5, %v396_v6 }
 0x139   : > { %v361_v3 = vmul.f32 %v864_v50, %v360_v0 }
 0x13a   : > { %v385_v4 = vsel %vm384_vm10, %v862_v48, %v381_v2 }
 0x13b   : > { %v389_v7 = vmul.f32 %v385_v4, %v1140_v23  ;;  %v365_v8 = vsel %vm364_vm12, %v864_v50, %v361_v3 }
 0x13c   : > { %v387_v10 = vmul.f32 %v365_v8, %v1142_v24 }
 0x13d   : > { %v397_v11 = vmul.f32 %v853_v62, %v389_v7 }
 0x13e   : > { %v395_v12 = vmul.f32 %v853_v62, %v387_v10 }
 0x13f   : > { %v405_v14 = vadd.f32 %v854_v5, %v397_v11 }
 0x140   : > { %v403_v16 = vadd.f32 %v854_v5, %v395_v12 }
 0x141   : > { %v759_v17 = vpack.c.bf16 %v405_v14, %v404_v13 }
 0x142   : > { %v754_v18 = vpack.c.bf16 %v403_v16, %v402_v15 }
 0x143   : > { %771 = vst [vmem:[#allocation2 + $0x8] sm:$0xff] %v759_v17  }
 0x144   : > { %755 = vst [vmem:[#allocation2] sm:$0xff] %v754_v18  }
 0x145 PF: > { %v750_v19 = vld [vmem:[%s1115_s18 + $0x38] sm:$0xff]  ;;  %v749_v20 = vld [vmem:[%s1115_s18 + $0x30] sm:$0xff]  ;;  %v748_v21 = vld [vmem:[%s1115_s18 + $0x28] sm:$0xff]  ;;  %s738_s10 = sshll.u32 (%p1090_p0), %s972_s21, 2 }
 0x146   : > { %498 = vmatpush.bf16.msra.mxu0 %v750_v19  ;;  %773 = vmatpush.bf16.msra.mxu1 %v750_v19  ;;  %v747_v22 = vld [vmem:[%s1115_s18 + $0x20] sm:$0xff]  ;;  %v746_v23 = vld [vmem:[%s1115_s18 + $0x18] sm:$0xff]  ;;  %v745_v24 = vld [vmem:[%s1115_s18 + $0x10] sm:$0xff]  ;;  %s536_s13 = scalar_lea.vmem (%p1090_p0), %s1206_s5, %s738_s10 }
 0x147   : > { %v744_v25 = vld [vmem:[%s1115_s18 + $0x8] sm:$0xff]  ;;  %v743_v26 = vld [vmem:[%s1115_s18] sm:$0xff]  ;;  %v865_v31 = vld [vmem:[%s293_s29] ss:$0 sm:$0xff] }
 0x14a   : > { %499 = vmatpush.bf16.msra.mxu0 %v749_v20  ;;  %774 = vmatpush.bf16.msra.mxu1 %v749_v20  ;;  %v742_v28 = vld [vmem:[#allocation2 + $0x8] sm:$0xff] }
 0x14b   : > { %v741_v27 = vld [vmem:[#allocation2] sm:$0xff] }
 0x14e   : > { %500 = vmatpush.bf16.msra.mxu0 %v748_v21  ;;  %775 = vmatpush.bf16.msra.mxu1 %v748_v21 }
 0x152   : > { %501 = vmatpush.bf16.msra.mxu0 %v747_v22  ;;  %776 = vmatpush.bf16.msra.mxu1 %v747_v22 }
 0x156   : > { %502 = vmatpush.bf16.msra.mxu0 %v746_v23  ;;  %777 = vmatpush.bf16.msra.mxu1 %v746_v23 }
 0x15a   : > { %503 = vmatpush.bf16.msra.mxu0 %v745_v24  ;;  %778 = vmatpush.bf16.msra.mxu1 %v745_v24 }
 0x15e   : > { %504 = vmatpush.bf16.msra.mxu0 %v744_v25  ;;  %779 = vmatpush.bf16.msra.mxu1 %v744_v25 }
 0x162   : > { %505 = vmatpush.bf16.msra.mxu0 %v743_v26  ;;  %780 = vmatpush.bf16.msra.mxu1 %v743_v26 }
 0x165   : > { %506 = vmatmul.bf16.vlgmr.msra.gmra.mxu0 %v741_v27  ;;  %511 = vmatmul.bf16.vlgmr.msra.gmra.mxu1 %v742_v28 }
 0x1e2   : > { %v507_v29 = vpop.f32.mrf.mxu0  ;;  %v512_v30 = vpop.f32.mrf.mxu1 }
 0x1e3   : > { %v508_v34 = vadd.f32 %v865_v31, %v507_v29  ;;  %v513_v35 = vadd.f32 %v865_v31, %v512_v30 }
 0x1ea   : > { %v509_v32 = vpop.f32.mrf.mxu0  ;;  %v514_v33 = vpop.f32.mrf.mxu1 }
 0x1eb   : > { %v510_v36 = vadd.f32 %v865_v31, %v509_v32  ;;  %v515_v37 = vadd.f32 %v865_v31, %v514_v33 }
 0x1ec   : > { %531 = sbr.rel (!%p1090_p0) target bundleno = 507 (0x1fb), region = 56 }
 0x1ed   : > { %v764_v38 = vpack.c.bf16 %v510_v36, %v508_v34  ;;  %v769_v39 = vpack.c.bf16 %v515_v37, %v513_v35 }
 0x1ef   : > { %765 = vst [vmem:[%s1129_s30] sm:$0xff] %v764_v38  }
 0x1f0   : > { %772 = vst [vmem:[%s1129_s30 + $0x8] sm:$0xff] %v769_v39  }
 0x1f6   : > { %v553_v40 = vld [vmem:[%s1129_s30] sm:$0xf]  ;;  %v555_v41 = vld [vmem:[%s1129_s30 + $0x4] sm:$0xf] }
 0x1f7   : > { %v557_v42 = vld [vmem:[%s1129_s30 + $0x8] sm:$0xf]  ;;  %554 = vst [vmem:[%s536_s13] sm:$0xf] %v553_v40  ;;  %v559_v43 = vld [vmem:[%s1129_s30 + $0xc] sm:$0xf] }
 0x1f8   : > { %556 = vst [vmem:[%s536_s13 + $0xc] sm:$0xf] %v555_v41 }
 0x1f9   : > { %558 = vst [vmem:[%s536_s13 + $0x18] sm:$0xf] %v557_v42 }
 0x1fa   : > { %560 = vst [vmem:[%s536_s13 + $0x24] sm:$0xf] %v559_v43 }
 0x1fb PF: > { %s19_s23 = sadd.s32 1, %s980_s23   ;;  %s1215_s18 = smov %s964_s19 }
 0x1fc   : > { %p16_p5 = scmp.ge.s32.totalorder %s19_s23, 5   ;;  %s1216_s19 = smov %s968_s20 }
 0x1fd   : > { %s1217_s20 = smov %s1099_s24  ;;  %s1218_s21 = smov %s976_s22 }
 0x1fe   : > { %s1219_s22 = smov %s1221_s11  ;;  %18 = sbr.rel (!%p16_p5) target bundleno = 7 (0x7), region = 134 }
 0x203   :  { %602 = vsyncpa [#allocation4], 1 }
 0x204   :  { %604 = vsyncpa [#allocation4 + $0x1], 1 }
 0x205   :  { %605 = vsyncpa [#allocation6], 1 }
 0x206   :  { %607 = vsyncpa [#allocation6 + $0x1], 1 }

// kernel: transformer_encoder_block.8
= control target key start
LH: loop header
LB: loop body
LE: loop exit
PB: predicated region body
PF: predicated region fallthrough
CT: control target
= control target key end

     0   :  { %v525_v4 = vmov 128.0   ;;  %s746_s0 = inlined_call_operand.vmem [shape: f32[32,128], index: 0, kind: input, shape index: {}]   ;;  %s747_s1 = inlined_call_operand.vmem [shape: f32[1,128], index: 1, kind: input, shape index: {}]   ;;  %s748_s2 = inlined_call_operand.vmem [shape: f32[1,128], index: 2, kind: input, shape index: {}]   ;;  %s749_s3 = inlined_call_operand.vmem [shape: bf16[128,256], index: 3, kind: input, shape index: {}]   ;;  %s750_s4 = inlined_call_operand.vmem [shape: f32[1,256], index: 4, kind: input, shape index: {}]   ;;  %s751_s5 = inlined_call_operand.vmem [shape: bf16[32,256], index: 5, kind: output, shape index: {}]  }
   0x1   :  { %v26_v0 = vld [vmem:[%s746_s0 + $0x10] sm:$0xff]  ;;  %v24_v1 = vld [vmem:[%s746_s0] sm:$0xff]  ;;  %v27_v2 = vld [vmem:[%s746_s0 + $0x18] sm:$0xff]  ;;  %499 = vrcp.f32 %v525_v4 }
   0x2   :  { %32 = vadd.xlane.f32.xlu0 %v26_v0  ;;  %28 = vadd.xlane.f32.xlu1 %v24_v1  ;;  %v25_v3 = vld [vmem:[%s746_s0 + $0x8] sm:$0xff]  ;;  %v445_v27 = vld [vmem:[%s749_s3 + $0x70] sm:$0xf]  ;;  %v468_v28 = vld [vmem:[%s749_s3 + $0x74] sm:$0xf0] }
   0x3   :  { %v467_v29 = vld [vmem:[%s749_s3 + $0x74] sm:$0xf]  ;;  %v446_v30 = vor.u32 %v468_v28, %v445_v27  ;;  %v447_v31 = vld [vmem:[%s749_s3 + $0x78] sm:$0xf0]  ;;  %v437_v33 = vld [vmem:[%s749_s3 + $0x60] sm:$0xf] }
   0x4   :  { %v450_v32 = vor.u32 %v467_v29, %v447_v31  ;;  %v466_v34 = vld [vmem:[%s749_s3 + $0x64] sm:$0xf0]  ;;  %v465_v35 = vld [vmem:[%s749_s3 + $0x64] sm:$0xf]  ;;  %v439_v37 = vld [vmem:[%s749_s3 + $0x68] sm:$0xf0] }
   0x5   :  { %257 = vmatpush.bf16.msra.mxu0 %v446_v30  ;;  %480 = vmatpush.bf16.msra.mxu2 %v446_v30  ;;  %v438_v36 = vor.u32 %v466_v34, %v437_v33  ;;  %v442_v38 = vor.u32 %v465_v35, %v439_v37  ;;  %v429_v39 = vld [vmem:[%s749_s3 + $0x50] sm:$0xf]  ;;  %v464_v40 = vld [vmem:[%s749_s3 + $0x54] sm:$0xf0]  ;;  %v463_v41 = vld [vmem:[%s749_s3 + $0x54] sm:$0xf] }
   0x6   :  { %276 = vmatpush.bf16.msra.mxu1 %v450_v32  ;;  %488 = vmatpush.bf16.msra.mxu3 %v450_v32  ;;  %v430_v42 = vor.u32 %v464_v40, %v429_v39  ;;  %v431_v43 = vld [vmem:[%s749_s3 + $0x58] sm:$0xf0]  ;;  %v421_v45 = vld [vmem:[%s749_s3 + $0x40] sm:$0xf]  ;;  %v462_v46 = vld [vmem:[%s749_s3 + $0x44] sm:$0xf0] }
   0x7   :  { %v500_v5 = vpop.eup %499  ;;  %v434_v44 = vor.u32 %v463_v41, %v431_v43  ;;  %v461_v47 = vld [vmem:[%s749_s3 + $0x44] sm:$0xf]  ;;  %v422_v48 = vor.u32 %v462_v46, %v421_v45  ;;  %v423_v49 = vld [vmem:[%s749_s3 + $0x48] sm:$0xf0]  ;;  %v413_v51 = vld [vmem:[%s749_s3 + $0x30] sm:$0xf] }
   0x8   :  { %v37_v6 = vmul.f32 128.0, %v500_v5  ;;  %vm41_vm0 = vweird.f32 %v500_v5  ;;  %v426_v50 = vor.u32 %v461_v47, %v423_v49  ;;  %v460_v52 = vld [vmem:[%s749_s3 + $0x34] sm:$0xf0]  ;;  %v459_v53 = vld [vmem:[%s749_s3 + $0x34] sm:$0xf] }
   0x9   :  { %258 = vmatpush.bf16.msra.mxu0 %v438_v36  ;;  %481 = vmatpush.bf16.msra.mxu2 %v438_v36  ;;  %v414_v56 = vor.u32 %v460_v52, %v413_v51  ;;  %v415_v57 = vld [vmem:[%s749_s3 + $0x38] sm:$0xf0]  ;;  %v405_v63 = vld [vmem:[%s749_s3 + $0x20] sm:$0xf] }
   0xa   :  { %34 = vadd.xlane.f32.xlu0 %v27_v2  ;;  %30 = vadd.xlane.f32.xlu1 %v25_v3  ;;  %v38_v7 = vsub.f32 1.0, %v37_v6  ;;  %v418_v60 = vor.u32 %v459_v53, %v415_v57  ;;  %v456_v6 = vld [vmem:[%s749_s3 + $0x14] sm:$0xf0]  ;;  %v498_v57 = vld [vmem:[%s748_s2] ss:$0 sm:$0xff] }
   0xb   :  { %277 = vmatpush.bf16.msra.mxu1 %v442_v38  ;;  %489 = vmatpush.bf16.msra.mxu3 %v442_v38 }
   0xc   :  { %v39_v8 = vmul.f32 %v500_v5, %v38_v7  ;;  %v455_v7 = vld [vmem:[%s749_s3 + $0x14] sm:$0xf] }
   0xd   :  { %259 = vmatpush.bf16.msra.mxu0 %v430_v42  ;;  %482 = vmatpush.bf16.msra.mxu2 %v430_v42 }
   0xe   :  { %v40_v9 = vadd.f32 %v500_v5, %v39_v8 }
   0xf   :  { %278 = vmatpush.bf16.msra.mxu1 %v434_v44  ;;  %490 = vmatpush.bf16.msra.mxu3 %v434_v44 }
  0x10   :  { %v568_v10 = vsel %vm41_vm0, %v500_v5, %v40_v9  ;;  %v397_v5 = vld [vmem:[%s749_s3 + $0x10] sm:$0xf] }
  0x11   :  { %260 = vmatpush.bf16.msra.mxu0 %v422_v48  ;;  %483 = vmatpush.bf16.msra.mxu2 %v422_v48 }
  0x13   :  { %279 = vmatpush.bf16.msra.mxu1 %v426_v50  ;;  %491 = vmatpush.bf16.msra.mxu3 %v426_v50  ;;  %v497_v50 = vld [vmem:[%s747_s1] ss:$0 sm:$0xff] }
  0x15   :  { %261 = vmatpush.bf16.msra.mxu0 %v414_v56  ;;  %484 = vmatpush.bf16.msra.mxu2 %v414_v56 }
  0x17   :  { %280 = vmatpush.bf16.msra.mxu1 %v418_v60  ;;  %492 = vmatpush.bf16.msra.mxu3 %v418_v60 }
  0x75   :  { %v33_v11 = vpop.xlane.xlu0 %32  ;;  %v29_v12 = vpop.xlane.xlu1 %28 }
  0x76   :  { %v45_v13 = vmul.f32 %v568_v10, %v33_v11  ;;  %v43_v14 = vmul.f32 %v568_v10, %v29_v12  ;;  %v398_v11 = vor.u32 %v456_v6, %v397_v5  ;;  %v399_v12 = vld [vmem:[%s749_s3 + $0x18] sm:$0xf0] }
  0x78   :  { %v572_v15 = vsub.f32 %v24_v1, %v43_v14  ;;  %v574_v16 = vsub.f32 %v26_v0, %v45_v13  ;;  %v458_v0 = vld [vmem:[%s749_s3 + $0x24] sm:$0xf0]  ;;  %v457_v1 = vld [vmem:[%s749_s3 + $0x24] sm:$0xf]  ;;  %v389_v13 = vld [vmem:[%s749_s3] sm:$0xf] }
  0x79   :  { %v454_v14 = vld [vmem:[%s749_s3 + $0x4] sm:$0xf0] }
  0x7a   :  { %v53_v17 = vmul.f32 %v574_v16, %v574_v16  ;;  %v51_v18 = vmul.f32 %v572_v15, %v572_v15  ;;  %v390_v27 = vor.u32 %v454_v14, %v389_v13 }
  0x7c   :  { %59 = vadd.xlane.f32.xlu2 %v53_v17  ;;  %55 = vadd.xlane.f32.xlu0 %v51_v18 }
  0x7d   :  { %v35_v19 = vpop.xlane.xlu0 %34  ;;  %v31_v20 = vpop.xlane.xlu1 %30 }
  0x7e   :  { %v46_v21 = vmul.f32 %v568_v10, %v35_v19  ;;  %v44_v22 = vmul.f32 %v568_v10, %v31_v20  ;;  %v402_v19 = vor.u32 %v455_v7, %v399_v12  ;;  %v453_v20 = vld [vmem:[%s749_s3 + $0x4] sm:$0xf] }
  0x80   :  { %v582_v23 = vsub.f32 %v27_v2, %v46_v21  ;;  %v584_v24 = vsub.f32 %v25_v3, %v44_v22  ;;  %v407_v2 = vld [vmem:[%s749_s3 + $0x28] sm:$0xf0]  ;;  %v406_v3 = vor.u32 %v458_v0, %v405_v63 }
  0x81   :  { %v410_v4 = vor.u32 %v457_v1, %v407_v2  ;;  %v391_v21 = vld [vmem:[%s749_s3 + $0x8] sm:$0xf0] }
  0x82   :  { %v54_v25 = vmul.f32 %v582_v23, %v582_v23  ;;  %v52_v26 = vmul.f32 %v584_v24, %v584_v24  ;;  %262 = vmatpush.bf16.msra.mxu0 %v406_v3  ;;  %485 = vmatpush.bf16.msra.mxu2 %v406_v3 }
  0x83   :  { %281 = vmatpush.bf16.msra.mxu1 %v410_v4  ;;  %493 = vmatpush.bf16.msra.mxu3 %v410_v4 }
  0x84   :  { %61 = vadd.xlane.f32.xlu2 %v54_v25  ;;  %57 = vadd.xlane.f32.xlu1 %v52_v26 }
  0x86   :  { %263 = vmatpush.bf16.msra.mxu0 %v398_v11  ;;  %486 = vmatpush.bf16.msra.mxu2 %v398_v11 }
  0x87   :  { %282 = vmatpush.bf16.msra.mxu1 %v402_v19  ;;  %494 = vmatpush.bf16.msra.mxu3 %v402_v19 }
  0x8a   :  { %264 = vmatpush.bf16.msra.mxu0 %v390_v27  ;;  %487 = vmatpush.bf16.msra.mxu2 %v390_v27 }
  0xef   :  { %v60_v54 = vpop.xlane.xlu2 %59  ;;  %v56_v55 = vpop.xlane.xlu0 %55 }
  0xf0   :  { %v65_v58 = vmul.f32 %v60_v54, %v568_v10  ;;  %v63_v59 = vmul.f32 %v56_v55, %v568_v10 }
  0xf2   :  { %v652_v61 = vadd.f32 1e-05, %v65_v58  ;;  %v654_v62 = vadd.f32 1e-05, %v63_v59 }
  0xf4   :  { %501 = vrsqrt.f32 %v652_v61  ;;  %vm77_vm2 = vweird.f32 %v654_v62  ;;  %vm97_vm4 = vweird.f32 %v652_v61 }
  0xf5   :  { %503 = vrsqrt.f32 %v654_v62 }
  0xf7   :  { %v62_v8 = vpop.xlane.xlu2 %61  ;;  %v58_v9 = vpop.xlane.xlu1 %57 }
  0xf8   :  { %v66_v17 = vmul.f32 %v62_v8, %v568_v10  ;;  %v64_v18 = vmul.f32 %v58_v9, %v568_v10  ;;  %v394_v10 = vor.u32 %v453_v20, %v391_v21 }
  0xfa   :  { %v502_v22 = vpop.eup %501  ;;  %v70_v25 = vadd.f32 1e-05, %v66_v17  ;;  %v68_v26 = vadd.f32 1e-05, %v64_v18  ;;  %283 = vmatpush.bf16.msra.mxu1 %v394_v10  ;;  %495 = vmatpush.bf16.msra.mxu3 %v394_v10 }
  0xfb   :  { %v504_v28 = vpop.eup %503  ;;  %v92_v29 = vmul.f32 %v502_v22, %v652_v61  ;;  %vm98_vm1 = vweird.f32 %v502_v22 }
  0xfc   :  { %v72_v30 = vmul.f32 %v504_v28, %v654_v62  ;;  %505 = vrsqrt.f32 %v70_v25  ;;  %vm78_vm3 = vweird.f32 %v504_v28  ;;  %vm99_vm5 = vmor %vm97_vm4, %vm98_vm1  ;;  %vm87_vm8 = vweird.f32 %v68_v26 }
  0xfd   :  { %v93_v31 = vmul.f32 %v502_v22, %v92_v29  ;;  %507 = vrsqrt.f32 %v68_v26  ;;  %vm79_vm6 = vmor %vm77_vm2, %vm78_vm3  ;;  %vm107_vm10 = vweird.f32 %v70_v25 }
  0xfe   :  { %v73_v32 = vmul.f32 %v504_v28, %v72_v30 }
  0xff   :  { %v94_v33 = vmul.f32 0.5, %v93_v31 }
 0x100   :  { %v74_v34 = vmul.f32 0.5, %v73_v32 }
 0x101   :  { %v95_v35 = vsub.f32 1.5, %v94_v33 }
 0x102   :  { %v506_v36 = vpop.eup %505  ;;  %v75_v37 = vsub.f32 1.5, %v74_v34 }
 0x103   :  { %v508_v38 = vpop.eup %507  ;;  %v96_v39 = vmul.f32 %v502_v22, %v95_v35  ;;  %v102_v40 = vmul.f32 %v506_v36, %v70_v25  ;;  %vm108_vm7 = vweird.f32 %v506_v36 }
 0x104   :  { %v76_v41 = vmul.f32 %v504_v28, %v75_v37  ;;  %v82_v42 = vmul.f32 %v508_v38, %v68_v26  ;;  %vm88_vm9 = vweird.f32 %v508_v38  ;;  %vm109_vm11 = vmor %vm107_vm10, %vm108_vm7 }
 0x105   :  { %v103_v43 = vmul.f32 %v506_v36, %v102_v40  ;;  %v100_v45 = vsel %vm99_vm5, %v502_v22, %v96_v39  ;;  %vm89_vm12 = vmor %vm87_vm8, %vm88_vm9 }
 0x106   :  { %v83_v44 = vmul.f32 %v508_v38, %v82_v42  ;;  %v80_v47 = vsel %vm79_vm6, %v504_v28, %v76_v41  ;;  %v113_v51 = vmul.f32 %v100_v45, %v574_v16 }
 0x107   :  { %v104_v46 = vmul.f32 0.5, %v103_v43  ;;  %v111_v53 = vmul.f32 %v80_v47, %v572_v15 }
 0x108   :  { %v84_v48 = vmul.f32 0.5, %v83_v44  ;;  %v121_v58 = vmul.f32 %v497_v50, %v113_v51 }
 0x109   :  { %v105_v49 = vsub.f32 1.5, %v104_v46  ;;  %v119_v16 = vmul.f32 %v497_v50, %v111_v53 }
 0x10a   :  { %v85_v52 = vsub.f32 1.5, %v84_v48  ;;  %v129_v15 = vadd.f32 %v498_v57, %v121_v58 }
 0x10b   :  { %v106_v54 = vmul.f32 %v506_v36, %v105_v49  ;;  %v127_v1 = vadd.f32 %v498_v57, %v119_v16 }
 0x10c   :  { %v86_v55 = vmul.f32 %v508_v38, %v85_v52 }
 0x10d   :  { %v110_v56 = vsel %vm109_vm11, %v506_v36, %v106_v54 }
 0x10e   :  { %v114_v59 = vmul.f32 %v110_v56, %v582_v23  ;;  %v90_v60 = vsel %vm89_vm12, %v508_v38, %v86_v55  ;;  %v159_v23 = vld [vmem:[%s750_s4] sm:$0x3] }
 0x10f   :  { %v112_v61 = vmul.f32 %v90_v60, %v584_v24  ;;  %v161_v24 = vperm.slane %v159_v23, 0  ;;  %v162_v7 = vperm.slane %v159_v23, 1 }
 0x110   :  { %v122_v62 = vmul.f32 %v497_v50, %v114_v59 }
 0x111   :  { %v120_v63 = vmul.f32 %v497_v50, %v112_v61 }
 0x112   :  { %v130_v0 = vadd.f32 %v498_v57, %v122_v62 }
 0x113   :  { %v128_v2 = vadd.f32 %v498_v57, %v120_v63 }
 0x114   :  { %v477_v3 = vpack.c.bf16 %v130_v0, %v129_v15 }
 0x115   :  { %v472_v4 = vpack.c.bf16 %v128_v2, %v127_v1 }
 0x116   :  { %479 = vst [vmem:[#allocation2 + $0x8] sm:$0xff] %v477_v3  }
 0x117   :  { %473 = vst [vmem:[#allocation2] sm:$0xff] %v472_v4  }
 0x11d   :  { %v452_v5 = vld [vmem:[#allocation2 + $0x8] sm:$0xff] }
 0x11e   :  { %v451_v6 = vld [vmem:[#allocation2] sm:$0xff]  ;;  %270 = vmatmul.bf16.vlgmr.msra.gmra.mxu2 %v452_v5  ;;  %289 = vmatmul.bf16.vlgmr.msra.gmra.mxu3 %v452_v5 }
 0x11f   :  { %265 = vmatmul.bf16.vlgmr.msra.gmra.mxu0 %v451_v6  ;;  %284 = vmatmul.bf16.vlgmr.msra.gmra.mxu1 %v451_v6 }
 0x19c   :  { %v266_v8 = vpop.f32.mrf.mxu0  ;;  %v285_v9 = vpop.f32.mrf.mxu1 }
 0x19d   :  { %v267_v11 = vadd.f32 %v266_v8, %v161_v24  ;;  %v286_v12 = vadd.f32 %v285_v9, %v162_v7 }
 0x19f   :  { %v303_v13 = vmul.f32 %v267_v11, %v267_v11  ;;  %v304_v14 = vmul.f32 %v286_v12, %v286_v12  ;;  %v295_v61 = vmul.f32 0.5, %v267_v11  ;;  %v296_v0 = vmul.f32 0.5, %v286_v12 }
 0x1a1   :  { %v311_v17 = vmul.f32 %v303_v13, %v267_v11  ;;  %v312_v18 = vmul.f32 %v304_v14, %v286_v12  ;;  %v271_v19 = vpop.f32.mrf.mxu2  ;;  %v290_v20 = vpop.f32.mrf.mxu3 }
 0x1a2   :  { %v272_v21 = vadd.f32 %v271_v19, %v161_v24  ;;  %v713_v22 = vadd.f32 %v290_v20, %v162_v7 }
 0x1a3   :  { %v319_v25 = vmul.f32 0.044715, %v311_v17  ;;  %v320_v26 = vmul.f32 0.044715, %v312_v18 }
 0x1a4   :  { %v307_v27 = vmul.f32 %v272_v21, %v272_v21  ;;  %v308_v28 = vmul.f32 %v713_v22, %v713_v22  ;;  %v268_v29 = vpop.f32.mrf.mxu0  ;;  %v287_v10 = vpop.f32.mrf.mxu1  ;;  %v299_v9 = vmul.f32 0.5, %v272_v21 }
 0x1a5   :  { %v327_v30 = vadd.f32 %v319_v25, %v267_v11  ;;  %v328_v31 = vadd.f32 %v320_v26, %v286_v12  ;;  %v717_v32 = vadd.f32 %v268_v29, %v161_v24  ;;  %v719_v33 = vadd.f32 %v287_v10, %v162_v7 }
 0x1a6   :  { %v315_v34 = vmul.f32 %v307_v27, %v272_v21  ;;  %v316_v35 = vmul.f32 %v308_v28, %v713_v22  ;;  %v300_v11 = vmul.f32 0.5, %v713_v22 }
 0x1a7   :  { %v335_v36 = vmul.f32 0.7978846, %v327_v30  ;;  %v336_v37 = vmul.f32 0.7978846, %v328_v31  ;;  %v305_v38 = vmul.f32 %v717_v32, %v717_v32  ;;  %v306_v41 = vmul.f32 %v719_v33, %v719_v33 }
 0x1a8   :  { %v323_v39 = vmul.f32 0.044715, %v315_v34  ;;  %v324_v40 = vmul.f32 0.044715, %v316_v35  ;;  %v297_v26 = vmul.f32 0.5, %v717_v32 }
 0x1a9   :  { %509 = vtanh.f32 %v335_v36  ;;  %v313_v42 = vmul.f32 %v305_v38, %v717_v32  ;;  %v273_v43 = vpop.f32.mrf.mxu2  ;;  %v292_v44 = vpop.f32.mrf.mxu3  ;;  %v314_v47 = vmul.f32 %v306_v41, %v719_v33 }
 0x1aa   :  { %511 = vtanh.f32 %v336_v37  ;;  %v331_v45 = vadd.f32 %v323_v39, %v272_v21  ;;  %v332_v46 = vadd.f32 %v324_v40, %v713_v22  ;;  %v274_v49 = vadd.f32 %v273_v43, %v161_v24 }
 0x1ab   :  { %v321_v48 = vmul.f32 0.044715, %v313_v42  ;;  %v293_v50 = vadd.f32 %v292_v44, %v162_v7  ;;  %v322_v53 = vmul.f32 0.044715, %v314_v47  ;;  %v298_v21 = vmul.f32 0.5, %v719_v33 }
 0x1ac   :  { %v339_v51 = vmul.f32 0.7978846, %v331_v45  ;;  %v340_v52 = vmul.f32 0.7978846, %v332_v46  ;;  %v309_v55 = vmul.f32 %v274_v49, %v274_v49  ;;  %v301_v35 = vmul.f32 0.5, %v274_v49 }
 0x1ad   :  { %v329_v54 = vadd.f32 %v321_v48, %v717_v32  ;;  %v330_v56 = vadd.f32 %v322_v53, %v719_v33  ;;  %v310_v57 = vmul.f32 %v293_v50, %v293_v50  ;;  %v302_v32 = vmul.f32 0.5, %v293_v50 }
 0x1ae   :  { %513 = vtanh.f32 %v339_v51  ;;  %v317_v60 = vmul.f32 %v309_v55, %v274_v49 }
 0x1af   :  { %v510_v58 = vpop.eup %509  ;;  %515 = vtanh.f32 %v340_v52  ;;  %v337_v59 = vmul.f32 0.7978846, %v329_v54  ;;  %v338_v63 = vmul.f32 0.7978846, %v330_v56  ;;  %v318_v15 = vmul.f32 %v310_v57, %v293_v50 }
 0x1b0   :  { %v512_v16 = vpop.eup %511  ;;  %v351_v62 = vadd.f32 1.0, %v510_v58  ;;  %v325_v2 = vmul.f32 0.044715, %v317_v60 }
 0x1b1   :  { %v352_v1 = vadd.f32 1.0, %v512_v16  ;;  %517 = vtanh.f32 %v337_v59  ;;  %v326_v4 = vmul.f32 0.044715, %v318_v15 }
 0x1b2   :  { %v359_v3 = vmul.f32 %v351_v62, %v295_v61  ;;  %519 = vtanh.f32 %v338_v63  ;;  %v333_v6 = vadd.f32 %v325_v2, %v274_v49 }
 0x1b3   :  { %v360_v5 = vmul.f32 %v352_v1, %v296_v0  ;;  %v334_v24 = vadd.f32 %v326_v4, %v293_v50 }
 0x1b4   :  { %v514_v23 = vpop.eup %513  ;;  %v341_v14 = vmul.f32 0.7978846, %v333_v6 }
 0x1b5   :  { %v516_v7 = vpop.eup %515  ;;  %v367_v8 = vpack.c.bf16 %v360_v5, %v359_v3  ;;  %v355_v13 = vadd.f32 1.0, %v514_v23  ;;  %v342_v18 = vmul.f32 0.7978846, %v334_v24 }
 0x1b6   :  { %v356_v17 = vadd.f32 1.0, %v516_v7  ;;  %521 = vtanh.f32 %v341_v14 }
 0x1b7   :  { %v518_v12 = vpop.eup %517  ;;  %371 = vst [vmem:[%s751_s5] sm:$0xff] %v367_v8  ;;  %v363_v19 = vmul.f32 %v355_v13, %v299_v9  ;;  %523 = vtanh.f32 %v342_v18 }
 0x1b8   :  { %v520_v20 = vpop.eup %519  ;;  %v364_v25 = vmul.f32 %v356_v17, %v300_v11  ;;  %v353_v27 = vadd.f32 1.0, %v518_v12 }
 0x1b9   :  { %v354_v28 = vadd.f32 1.0, %v520_v20 }
 0x1ba   :  { %v369_v29 = vpack.c.bf16 %v364_v25, %v363_v19  ;;  %v361_v22 = vmul.f32 %v353_v27, %v297_v26 }
 0x1bb   :  { %v362_v10 = vmul.f32 %v354_v28, %v298_v21 }
 0x1bc   :  { %373 = vst [vmem:[%s751_s5 + $0x10] sm:$0xff] %v369_v29  ;;  %v522_v30 = vpop.eup %521 }
 0x1bd   :  { %v368_v31 = vpack.c.bf16 %v362_v10, %v361_v22  ;;  %v524_v34 = vpop.eup %523  ;;  %v357_v36 = vadd.f32 1.0, %v522_v30 }
 0x1be   :  { %v358_v37 = vadd.f32 1.0, %v524_v34 }
 0x1bf   :  { %372 = vst [vmem:[%s751_s5 + $0x8] sm:$0xff] %v368_v31  ;;  %v365_v33 = vmul.f32 %v357_v36, %v301_v35 }
 0x1c0   :  { %v366_v38 = vmul.f32 %v358_v37, %v302_v32 }
 0x1c2   :  { %v370_v39 = vpack.c.bf16 %v366_v38, %v365_v33 }
 0x1c4   :  { %374 = vst [vmem:[%s751_s5 + $0x18] sm:$0xff] %v370_v39 }

// kernel: transformer_encoder_block.6
= control target key start
LH: loop header
LB: loop body
LE: loop exit
PB: predicated region body
PF: predicated region fallthrough
CT: control target
= control target key end

     0   :  { %s941_s12 = smov 0   ;;  %s943_s13 = smov 0   ;;  %s1046_s0 = inlined_call_operand.vmem [shape: bf16[32,384], index: 0, kind: input, shape index: {}, may-alias: {0,1,2}]   ;;  %s1047_s1 = inlined_call_operand.vmem [shape: bf16[32,384], index: 1, kind: input, shape index: {}, may-alias: {0,1,2}]   ;;  %s1048_s2 = inlined_call_operand.vmem [shape: bf16[32,384], index: 2, kind: input, shape index: {}, may-alias: {0,1,2}]   ;;  %s1049_s3 = inlined_call_operand.vmem [shape: bf16[32,128], index: 3, kind: output, shape index: {}]  }
   0x1   :  { %s945_s14 = smov 0   ;;  %s947_s15 = smov 0  }
   0x2   :  { %s949_s16 = smov 0  }
   0x3 LB: > { %s32_s17 = sadd.s32 1, %s914_s15  ;;  %p50_p1 = scmp.ne.s32.totalorder %s906_s13, %s902_s12  ;;  %s918_s16 = sphi %s949_s16, %s13_s16   ;;  %s914_s15 = sphi %s947_s15, %s1054_s15   ;;  %s910_s14 = sphi %s945_s14, %s1053_s14   ;;  %s906_s13 = sphi %s943_s13, %s1052_s13   ;;  %s902_s12 = sphi %s941_s12, %s1051_s12  }
   0x4   : > { %p34_p0 = scmp.ge.s32.totalorder %s32_s17, 2  ;;  %p51_p2 = scmp.eq.s32.totalorder %s918_s16, 0 }
   0x5   : > { %s43_s20 = sadd.s32 1, %s906_s13  ;;  %p772_p5 = scmp.ge.s32.totalorder %s918_s16, 2 }
   0x6   : > { %s1056_s17 = smov (%p34_p0, %s32_s17), 0  ;;  %p972_p3 = por %p51_p2, %p50_p1 }
   0x7   : > { %s38_s19 = ssub.s32 %s914_s15, %s1056_s17  ;;  %166 = sbr.rel (%p772_p5) target bundleno = 33 (0x21), region = 16 }
   0x8   : > { %p41_p4 = scmp.eq.s32.totalorder %s38_s19, 0 }
   0xa   : > { %s980_s21 = scalar_select %p41_p4, %s906_s13, %s43_s20  }
   0xc   : > { %169 = sbr.rel (!%p972_p3) target bundleno = 19 (0x13), region = 20  ;;  %s171_s22 = sand.u32 (%p972_p3), 1, %s906_s13  }
   0xd   : > { %s817_s23 = smul.u32 (%p972_p3), 24, %s914_s15  ;;  %s773_s24 = sshll.u32 (%p972_p3), %s171_s22, 3 }
   0xe   : > { %s173_s28 = scalar_lea.vmem (%p972_p3), [#allocation2], %s773_s24 }
   0xf   : > { %s179_s27 = scalar_lea.vmem (%p972_p3), %s1046_s0, %s817_s23 }
  0x10   : > { %v196_v0 = vld [vmem:[%s179_s27] sm:$0xf] (%p972_p3)  ;;  %v198_v1 = vld [vmem:[%s179_s27 + $0xc] sm:$0xf] (%p972_p3) }
  0x11   : > { %197 = vst [vmem:[%s173_s28] sm:$0xf] %v196_v0 }
  0x12   : > { %199 = vst [vmem:[%s173_s28 + $0x4] sm:$0xf] %v198_v1 }
  0x13 PF: > { %227 = sbr.rel (!%p972_p3) target bundleno = 26 (0x1a), region = 61  ;;  %s229_s29 = sand.u32 (%p972_p3), 1, %s906_s13  }
  0x14   : > { %s778_s30 = smul.u32 (%p972_p3), 24, %s914_s15  ;;  %s777_s4 = sshll.u32 (%p972_p3), %s229_s29, 3 }
  0x15   : > { %s231_s8 = scalar_lea.vmem (%p972_p3), [#allocation3], %s777_s4 }
  0x16   : > { %s680_s7 = scalar_lea.vmem (%p972_p3), %s1047_s1, %s778_s30 }
  0x17   : > { %v779_v2 = vld [vmem:[%s680_s7 + $0x4] sm:$0xf] (%p972_p3)  ;;  %v780_v3 = vld [vmem:[%s680_s7 + $0x10] sm:$0xf] (%p972_p3) }
  0x18   : > { %255 = vst [vmem:[%s231_s8] sm:$0xf] %v779_v2 }
  0x19   : > { %257 = vst [vmem:[%s231_s8 + $0x4] sm:$0xf] %v780_v3 }
  0x1a PF: > { %285 = sbr.rel (!%p972_p3) target bundleno = 33 (0x21), region = 102  ;;  %s287_s9 = sand.u32 (%p972_p3), 1, %s906_s13  }
  0x1b   : > { %s782_s10 = smul.u32 (%p972_p3), 24, %s914_s15  ;;  %s781_s11 = sshll.u32 (%p972_p3), %s287_s9, 3 }
  0x1c   : > { %s289_s23 = scalar_lea.vmem (%p972_p3), [#allocation4], %s781_s11 }
  0x1d   : > { %s687_s22 = scalar_lea.vmem (%p972_p3), %s1048_s2, %s782_s10 }
  0x1e   : > { %v783_v4 = vld [vmem:[%s687_s22 + $0x8] sm:$0xf] (%p972_p3)  ;;  %v784_v5 = vld [vmem:[%s687_s22 + $0x14] sm:$0xf] (%p972_p3) }
  0x1f   : > { %313 = vst [vmem:[%s289_s23] sm:$0xf] %v783_v4 }
  0x20   : > { %315 = vst [vmem:[%s289_s23 + $0x4] sm:$0xf] %v784_v5 }
  0x21 PF: > { %p785_p6 = scmp.ge.s32.totalorder %s918_s16, 1  ;;  %p342_p7 = scmp.lt.s32.totalorder %s918_s16, 3 }
  0x23   : > { %p343_p8 = pnand %p785_p6, %p342_p7 }
  0x24   : > { %s349_s18 = sand.u32 (!%p343_p8), 1, %s902_s12   ;;  %s920_s26 = smov (!%p343_p8), 64  }
  0x25   : > { %346 = sbr.rel (%p343_p8) target bundleno = 703 (0x2bf), region = 143  ;;  %s786_s24 = sshll.u32 (!%p343_p8), %s349_s18, 3 }
  0x26   : > { %s358_s25 = scalar_lea.vmem (!%p343_p8), [#allocation3], %s786_s24  ;;  %s351_s27 = scalar_lea.vmem (!%p343_p8), [#allocation2], %s786_s24 }
  0x27   : > { %s365_s28 = scalar_lea.vmem (!%p343_p8), [#allocation4], %s786_s24  ;;  %s789_s12 = sshll.u32 (!%p343_p8), %s910_s14, 1 }
  0x28   : > { %p406_p9 = scmp.lt.s32.totalorder (!%p343_p8), %s789_s12, 3 }
  0x2a   : > { %vm432_vm0 = vcmask 523264   ;;  %v810_v6 = vld [vmem:[%s358_s25] sm:$0xff]  ;;  %v809_v8 = vld [vmem:[%s351_s27] sm:$0xff]  ;;  %vm455_vm1 = vcmask 130048   ;;  %s1058_s12 = smov (!%p406_p9, %s789_s12), 3 }
  0x2b   : > { %530 = vrot.lane.b32.xlu0 %v810_v6, %s920_s26  ;;  %v437_v7 = vsel %vm432_vm0, %v810_v6, 0  ;;  %v811_v9 = vld [vmem:[%s365_s28] sm:$0xff]  ;;  %s790_s14 = sshll.u32 %s1058_s12, 2 }
  0x2c   : > { %446 = vmatpush.bf16.xpose.msra.mxu0 %v437_v7  ;;  %573 = vrot.lane.b32.xlu2 %v811_v9, %s920_s26  ;;  %s412_s4 = scalar_lea.vmem %s1049_s3, %s790_s14 }
  0x2d   : > { %491 = vmatpush.bf16.msra.mxu1 %v811_v9 }
  0x33   : > { %528 = vrot.lane.b32.xlu0 %v809_v8, %s920_s26  ;;  %799 = vmatmul.msk.bf16.vlgmr.msra.gmra.mxu0 %vm432_vm0, %v809_v8 }
  0x86   : > { %v574_v19 = vpop.permute.xlu2 %573 }
  0x87   : > { %586 = vmatpush.bf16.msra.mxu3 %v574_v19 }
  0x9d   : > { %v531_v10 = vpop.permute.xlu0 %530 }
  0x9e   : > { %v536_v11 = vsel %vm432_vm0, %v531_v10, 0 }
  0x9f   : > { %545 = vmatpush.bf16.xpose.msra.mxu2 %v536_v11 }
  0xa5   : > { %v529_v12 = vpop.permute.xlu0 %528 }
  0xa6   : > { %805 = vmatmul.msk.bf16.vlgmr.msra.gmra.mxu2 %vm432_vm0, %v529_v12 }
  0xb0   : > { %v448_v13 = vpop.f32.mrf.mxu0 }
  0xb1   : > { %v453_v14 = vmul.f32 0.125, %v448_v13 }
  0xb3   : > { %v456_v15 = vsel %vm455_vm1, %v453_v14, -inf }
  0xb4   : > { %457 = vmax.xlane.f32.xlu2 %v456_v15 }
  0xb8   : > { %v450_v16 = vpop.f32.mrf.mxu0 }
  0xb9   : > { %v454_v17 = vmul.f32 0.125, %v450_v16 }
  0xbb   : > { %v459_v18 = vsel %vm455_vm1, %v454_v17, -inf }
  0xbc   : > { %460 = vmax.xlane.f32.xlu0 %v459_v18 }
 0x127   : > { %v458_v26 = vpop.xlane.xlu2 %457 }
 0x128   : > { %v462_v28 = vsub.f32 %v453_v14, %v458_v26 }
 0x129   : > { %v547_v20 = vpop.f32.mrf.mxu2 }
 0x12a   : > { %v552_v21 = vmul.f32 0.125, %v547_v20  ;;  %v464_v30 = vmul.f32 1.442695, %v462_v28 }
 0x12c   : > { %v554_v22 = vsel %vm455_vm1, %v552_v21, -inf  ;;  %864 = vpow2.f32 %v464_v30 }
 0x12d   : > { %555 = vmax.xlane.f32.xlu1 %v554_v22 }
 0x12f   : > { %v461_v27 = vpop.xlane.xlu0 %460 }
 0x130   : > { %v463_v29 = vsub.f32 %v454_v17, %v461_v27 }
 0x131   : > { %v549_v23 = vpop.f32.mrf.mxu2 }
 0x132   : > { %v553_v24 = vmul.f32 0.125, %v549_v23  ;;  %v466_v31 = vmul.f32 1.442695, %v463_v29  ;;  %v865_v32 = vpop.eup %864 }
 0x133   : > { %v468_v46 = vsel %vm455_vm1, %v865_v32, 0.0 }
 0x134   : > { %v557_v25 = vsel %vm455_vm1, %v553_v24, -inf  ;;  %866 = vpow2.f32 %v466_v31 }
 0x135   : > { %558 = vmax.xlane.f32.xlu1 %v557_v25 }
 0x13a   : > { %v867_v33 = vpop.eup %866 }
 0x13b   : > { %v474_v34 = vpack.c.bf16 %v867_v33, %v865_v32  ;;  %v471_v47 = vsel %vm455_vm1, %v867_v33, 0.0 }
 0x13d   : > { %804 = vmatmul.msk.bf16.vlgmr.msra.gmra.mxu1 %vm455_vm1, %v474_v34 }
 0x1a0   : > { %v556_v35 = vpop.xlane.xlu1 %555 }
 0x1a1   : > { %v560_v36 = vsub.f32 %v552_v21, %v556_v35 }
 0x1a3   : > { %v562_v37 = vmul.f32 1.442695, %v560_v36 }
 0x1a5   : > { %868 = vpow2.f32 %v562_v37 }
 0x1a8   : > { %v559_v38 = vpop.xlane.xlu1 %558 }
 0x1a9   : > { %v561_v39 = vsub.f32 %v553_v24, %v559_v38 }
 0x1ab   : > { %v869_v40 = vpop.eup %868  ;;  %v564_v41 = vmul.f32 1.442695, %v561_v39 }
 0x1ac   : > { %v566_v42 = vsel %vm455_vm1, %v869_v40, 0.0 }
 0x1ad   : > { %870 = vpow2.f32 %v564_v41  ;;  %567 = vadd.xlane.f32.xlu1 %v566_v42 }
 0x1b3   : > { %v871_v43 = vpop.eup %870 }
 0x1b4   : > { %v569_v44 = vsel %vm455_vm1, %v871_v43, 0.0  ;;  %v572_v45 = vpack.c.bf16 %v871_v43, %v869_v40 }
 0x1b5   : > { %570 = vadd.xlane.f32.xlu1 %v569_v44 }
 0x1b6   : > { %806 = vmatmul.msk.bf16.vlgmr.msra.gmra.mxu3 %vm455_vm1, %v572_v45 }
 0x1ba   : > { %v493_v21 = vpop.f32.mrf.mxu1 }
 0x1bd   : > { %469 = vadd.xlane.f32.xlu1 %v468_v46 }
 0x1c2   : > { %v495_v34 = vpop.f32.mrf.mxu1 }
 0x1c5   : > { %472 = vadd.xlane.f32.xlu1 %v471_v47 }
 0x220   : > { %v568_v48 = vpop.xlane.xlu1 %567 }
 0x221   : > { %872 = vrcp.f32 %v568_v48  ;;  %vm598_vm4 = vweird.f32 %v568_v48  ;;  %v604_v61 = vand.u32 2147483648, %v568_v48  ;;  %v602_v63 = vand.u32 2147483647, %v568_v48 }
 0x223   : > { %v605_v3 = vor.u32 1.1754944e-38, %v604_v61  ;;  %vm603_vm8 = vcmp.eq.f32.partialorder %v602_v63, 8.507059e+37 }
 0x227   : > { %v873_v50 = vpop.eup %872 }
 0x228   : > { %v571_v49 = vpop.xlane.xlu1 %570  ;;  %v594_v51 = vmul.f32 %v873_v50, %v568_v48  ;;  %vm599_vm2 = vweird.f32 %v873_v50 }
 0x229   : > { %874 = vrcp.f32 %v571_v49  ;;  %v619_v62 = vand.u32 2147483648, %v571_v49  ;;  %vm600_vm5 = vmor %vm598_vm4, %vm599_vm2  ;;  %vm613_vm6 = vweird.f32 %v571_v49  ;;  %v617_v0 = vand.u32 2147483647, %v571_v49 }
 0x22a   : > { %v595_v54 = vsub.f32 1.0, %v594_v51 }
 0x22b   : > { %v620_v4 = vor.u32 1.1754944e-38, %v619_v62  ;;  %vm618_vm9 = vcmp.eq.f32.partialorder %v617_v0, 8.507059e+37 }
 0x22c   : > { %v596_v56 = vmul.f32 %v873_v50, %v595_v54 }
 0x22e   : > { %v597_v59 = vadd.f32 %v873_v50, %v596_v56 }
 0x22f   : > { %v875_v52 = vpop.eup %874 }
 0x230   : > { %v609_v53 = vmul.f32 %v875_v52, %v571_v49  ;;  %vm614_vm3 = vweird.f32 %v875_v52  ;;  %v601_v1 = vsel %vm600_vm5, %v873_v50, %v597_v59  ;;  %v470_v11 = vpop.xlane.xlu1 %469 }
 0x231   : > { %vm615_vm7 = vmor %vm613_vm6, %vm614_vm3  ;;  %v606_v5 = vsel %vm603_vm8, %v605_v3, %v601_v1  ;;  %876 = vrcp.f32 %v470_v11  ;;  %vm503_vm12 = vweird.f32 %v470_v11  ;;  %v509_v24 = vand.u32 2147483648, %v470_v11 }
 0x232   : > { %v610_v55 = vsub.f32 1.0, %v609_v53  ;;  %v507_v26 = vand.u32 2147483647, %v470_v11 }
 0x233   : > { %v510_v30 = vor.u32 1.1754944e-38, %v509_v24 }
 0x234   : > { %v611_v57 = vmul.f32 %v875_v52, %v610_v55  ;;  %vm508_vm1 = vcmp.eq.f32.partialorder %v507_v26, 8.507059e+37 }
 0x236   : > { %v612_v60 = vadd.f32 %v875_v52, %v611_v57 }
 0x237   : > { %v877_v13 = vpop.eup %876 }
 0x238   : > { %v616_v2 = vsel %vm615_vm7, %v875_v52, %v612_v60  ;;  %v473_v12 = vpop.xlane.xlu1 %472  ;;  %v499_v15 = vmul.f32 %v877_v13, %v470_v11  ;;  %vm504_vm10 = vweird.f32 %v877_v13 }
 0x239   : > { %v588_v58 = vpop.f32.mrf.mxu3  ;;  %v621_v7 = vsel %vm618_vm9, %v620_v4, %v616_v2  ;;  %878 = vrcp.f32 %v473_v12  ;;  %v524_v25 = vand.u32 2147483648, %v473_v12  ;;  %vm505_vm13 = vmor %vm503_vm12, %vm504_vm10  ;;  %vm518_vm14 = vweird.f32 %v473_v12 }
 0x23a   : > { %v607_v8 = vmul.f32 %v606_v5, %v588_v58  ;;  %v500_v17 = vsub.f32 1.0, %v499_v15  ;;  %v522_v27 = vand.u32 2147483647, %v473_v12 }
 0x23b   : > { %v525_v31 = vor.u32 1.1754944e-38, %v524_v25 }
 0x23c   : > { %v501_v19 = vmul.f32 %v877_v13, %v500_v17  ;;  %vm523_vm2 = vcmp.eq.f32.partialorder %v522_v27, 8.507059e+37 }
 0x23e   : > { %v502_v22 = vadd.f32 %v877_v13, %v501_v19 }
 0x23f   : > { %v879_v14 = vpop.eup %878 }
 0x240   : > { %v514_v16 = vmul.f32 %v879_v14, %v473_v12  ;;  %vm519_vm11 = vweird.f32 %v879_v14  ;;  %v506_v28 = vsel %vm505_vm13, %v877_v13, %v502_v22 }
 0x241   : > { %v590_v6 = vpop.f32.mrf.mxu3  ;;  %vm520_vm15 = vmor %vm518_vm14, %vm519_vm11  ;;  %v511_v32 = vsel %vm508_vm1, %v510_v30, %v506_v28 }
 0x242   : > { %v622_v9 = vmul.f32 %v621_v7, %v590_v6  ;;  %v515_v18 = vsub.f32 1.0, %v514_v16  ;;  %v512_v36 = vmul.f32 %v511_v32, %v493_v21 }
 0x244   : > { %v859_v10 = vpack.i.bf16 %v622_v9, %v607_v8  ;;  %v516_v20 = vmul.f32 %v879_v14, %v515_v18 }
 0x246   : > { %860 = vrot.lane.b32.xlu1 %v859_v10, %s920_s26  ;;  %v517_v23 = vadd.f32 %v879_v14, %v516_v20 }
 0x248   : > { %v521_v29 = vsel %vm520_vm15, %v879_v14, %v517_v23 }
 0x249   : > { %v526_v33 = vsel %vm523_vm2, %v525_v31, %v521_v29 }
 0x24a   : > { %v527_v37 = vmul.f32 %v526_v33, %v495_v34 }
 0x2b8   : > { %v861_v35 = vpop.permute.xlu1 %860 }
 0x2b9   : > { %v863_v38 = vunpack.i.h.bf16 %v861_v35  ;;  %v862_v39 = vunpack.i.l.bf16 %v861_v35 }
 0x2bb   : > { %v632_v40 = vsel %vm432_vm0, %v527_v37, %v863_v38  ;;  %v631_v41 = vsel %vm432_vm0, %v512_v36, %v862_v39 }
 0x2bc   : > { %v815_v42 = vpack.c.bf16 %v632_v40, %v631_v41 }
 0x2be   : > { %816 = vst [vmem:[%s412_s4] sm:$0xff] %v815_v42  }
 0x2bf PF: > { %s13_s16 = sadd.s32 1, %s918_s16   ;;  %s1051_s12 = smov %s906_s13 }
 0x2c0   : > { %p10_p10 = scmp.ge.s32.totalorder %s13_s16, 4   ;;  %s1052_s13 = smov %s980_s21 }
 0x2c1   : > { %s1053_s14 = smov %s914_s15  ;;  %s1054_s15 = smov %s1056_s17 }
 0x2c2   :  { %12 = sbr.rel (!%p10_p10) target bundleno = 3 (0x3), region = 206 }

// kernel: transformer_encoder_block.9
= control target key start
LH: loop header
LB: loop body
LE: loop exit
PB: predicated region body
PF: predicated region fallthrough
CT: control target
= control target key end

     0   :  { %s506_s0 = inlined_call_operand.vmem [shape: bf16[32,256], index: 0, kind: input, shape index: {}]   ;;  %s507_s1 = inlined_call_operand.vmem [shape: bf16[256,128], index: 1, kind: input, shape index: {}]   ;;  %s508_s2 = inlined_call_operand.vmem [shape: f32[1,128], index: 2, kind: input, shape index: {}]   ;;  %s509_s3 = inlined_call_operand.vmem [shape: f32[32,128], index: 3, kind: input, shape index: {}]   ;;  %s510_s4 = inlined_call_operand.hbm [shape: f32[32,128], index: 4, kind: output, shape index: {}]  }
   0x1   :  { %v333_v0 = vld [vmem:[%s507_s1 + $0x38] sm:$0xff]  ;;  %v332_v2 = vld [vmem:[%s507_s1 + $0x30] sm:$0xff]  ;;  %v331_v4 = vld [vmem:[%s507_s1 + $0x28] sm:$0xff] }
   0x2   :  { %v341_v1 = vld [vmem:[%s507_s1 + $0x78] sm:$0xff]  ;;  %174 = vmatpush.bf16.msra.mxu0 %v333_v0  ;;  %342 = vmatpush.bf16.msra.mxu2 %v333_v0  ;;  %v340_v3 = vld [vmem:[%s507_s1 + $0x70] sm:$0xff]  ;;  %v339_v5 = vld [vmem:[%s507_s1 + $0x68] sm:$0xff] }
   0x3   :  { %193 = vmatpush.bf16.msra.mxu1 %v341_v1  ;;  %350 = vmatpush.bf16.msra.mxu3 %v341_v1 }
   0x6   :  { %175 = vmatpush.bf16.msra.mxu0 %v332_v2  ;;  %343 = vmatpush.bf16.msra.mxu2 %v332_v2 }
   0x7   :  { %194 = vmatpush.bf16.msra.mxu1 %v340_v3  ;;  %351 = vmatpush.bf16.msra.mxu3 %v340_v3 }
   0x8   :  { %9 = vsyncpa [#allocation3], 0  ;;  %v330_v6 = vld [vmem:[%s507_s1 + $0x20] sm:$0xff]  ;;  %v329_v8 = vld [vmem:[%s507_s1 + $0x18] sm:$0xff]  ;;  %s388_s16 = smov [#allocation2]   ;;  %s230_s20 = sshll.u32 %s510_s4, 4  ;;  %s231_s20 = int_to_ptr.hbm [resolvable:$true] %s230_s20 }
   0x9   :  { %v338_v7 = vld [vmem:[%s507_s1 + $0x60] sm:$0xff]  ;;  %v337_v9 = vld [vmem:[%s507_s1 + $0x58] sm:$0xff]  ;;  %v328_v10 = vld [vmem:[%s507_s1 + $0x10] sm:$0xff]  ;;  %s228_s17 = sshll.u32 %s388_s16, 4  ;;  %s389_s23 = smov 128   ;;  %s229_s17 = int_to_ptr.vmem [resolvable:$true] %s228_s17 }
   0xa   :  { %176 = vmatpush.bf16.msra.mxu0 %v331_v4  ;;  %344 = vmatpush.bf16.msra.mxu2 %v331_v4  ;;  %v336_v11 = vld [vmem:[%s507_s1 + $0x50] sm:$0xff]  ;;  %v327_v12 = vld [vmem:[%s507_s1 + $0x8] sm:$0xff]  ;;  %v326_v14 = vld [vmem:[%s507_s1] sm:$0xff]  ;;  %s390_s24 = smov 8  }
   0xb   :  { %195 = vmatpush.bf16.msra.mxu1 %v339_v5  ;;  %352 = vmatpush.bf16.msra.mxu3 %v339_v5  ;;  %v335_v13 = vld [vmem:[%s507_s1 + $0x48] sm:$0xff]  ;;  %v334_v15 = vld [vmem:[%s507_s1 + $0x40] sm:$0xff]  ;;  %v252_v18 = vld [vmem:[%s506_s0 + $0x10] sm:$0xf] }
   0xc   :  { %v244_v16 = vld [vmem:[%s506_s0] sm:$0xf]  ;;  %v323_v17 = vld [vmem:[%s506_s0 + $0x4] sm:$0xf0]  ;;  %v325_v19 = vld [vmem:[%s506_s0 + $0x14] sm:$0xf0] }
   0xd   :  { %v322_v20 = vld [vmem:[%s506_s0 + $0x4] sm:$0xf]  ;;  %v246_v21 = vld [vmem:[%s506_s0 + $0x8] sm:$0xf0]  ;;  %v324_v22 = vld [vmem:[%s506_s0 + $0x14] sm:$0xf]  ;;  %v245_v24 = vor.u32 %v323_v17, %v244_v16  ;;  %v253_v25 = vor.u32 %v325_v19, %v252_v18 }
   0xe   :  { %177 = vmatpush.bf16.msra.mxu0 %v330_v6  ;;  %345 = vmatpush.bf16.msra.mxu2 %v330_v6  ;;  %v254_v23 = vld [vmem:[%s506_s0 + $0x18] sm:$0xf0]  ;;  %v249_v26 = vor.u32 %v322_v20, %v246_v21  ;;  %v361_v28 = vld [vmem:[%s508_s2] ss:$0 sm:$0xff]  ;;  %v214_v38 = vld [vmem:[%s509_s3 + $0x10] sm:$0xff] }
   0xf   :  { %196 = vmatpush.bf16.msra.mxu1 %v338_v7  ;;  %353 = vmatpush.bf16.msra.mxu3 %v338_v7  ;;  %v257_v27 = vor.u32 %v324_v22, %v254_v23  ;;  %v212_v32 = vld [vmem:[%s509_s3] sm:$0xff]  ;;  %v213_v43 = vld [vmem:[%s509_s3 + $0x8] sm:$0xff]  ;;  %v215_v50 = vld [vmem:[%s509_s3 + $0x18] sm:$0xff] }
  0x12   :  { %178 = vmatpush.bf16.msra.mxu0 %v329_v8  ;;  %346 = vmatpush.bf16.msra.mxu2 %v329_v8 }
  0x13   :  { %197 = vmatpush.bf16.msra.mxu1 %v337_v9  ;;  %354 = vmatpush.bf16.msra.mxu3 %v337_v9 }
  0x16   :  { %179 = vmatpush.bf16.msra.mxu0 %v328_v10  ;;  %347 = vmatpush.bf16.msra.mxu2 %v328_v10 }
  0x17   :  { %198 = vmatpush.bf16.msra.mxu1 %v336_v11  ;;  %355 = vmatpush.bf16.msra.mxu3 %v336_v11 }
  0x1a   :  { %180 = vmatpush.bf16.msra.mxu0 %v327_v12  ;;  %348 = vmatpush.bf16.msra.mxu2 %v327_v12 }
  0x1b   :  { %199 = vmatpush.bf16.msra.mxu1 %v335_v13  ;;  %356 = vmatpush.bf16.msra.mxu3 %v335_v13 }
  0x1e   :  { %181 = vmatpush.bf16.msra.mxu0 %v326_v14  ;;  %349 = vmatpush.bf16.msra.mxu2 %v326_v14 }
  0x1f   :  { %200 = vmatpush.bf16.msra.mxu1 %v334_v15  ;;  %357 = vmatpush.bf16.msra.mxu3 %v334_v15 }
  0x21   :  { %182 = vmatmul.bf16.vlgmr.msra.gmra.mxu0 %v245_v24  ;;  %187 = vmatmul.bf16.vlgmr.msra.gmra.mxu2 %v253_v25 }
  0x22   :  { %201 = vmatmul.bf16.vlgmr.msra.gmra.mxu1 %v249_v26  ;;  %206 = vmatmul.bf16.vlgmr.msra.gmra.mxu3 %v257_v27 }
  0x9e   :  { %v183_v29 = vpop.f32.mrf.mxu0 }
  0x9f   :  { %v184_v30 = vadd.f32 %v361_v28, %v183_v29  ;;  %v202_v31 = vpop.f32.mrf.mxu1 }
  0xa1   :  { %v203_v33 = vadd.f32 %v202_v31, %v184_v30 }
  0xa3   :  { %v216_v34 = vadd.f32 %v212_v32, %v203_v33 }
  0xa4   :  { %v188_v35 = vpop.f32.mrf.mxu2 }
  0xa5   :  { %220 = vst [vmem:[#allocation2] sm:$0xff] %v216_v34  ;;  %v189_v36 = vadd.f32 %v361_v28, %v188_v35  ;;  %v207_v37 = vpop.f32.mrf.mxu3 }
  0xa6   :  { %v185_v39 = vpop.f32.mrf.mxu0 }
  0xa7   :  { %v208_v40 = vadd.f32 %v207_v37, %v189_v36  ;;  %v186_v41 = vadd.f32 %v361_v28, %v185_v39  ;;  %v204_v42 = vpop.f32.mrf.mxu1 }
  0xa9   :  { %v218_v44 = vadd.f32 %v214_v38, %v208_v40  ;;  %v205_v45 = vadd.f32 %v204_v42, %v186_v41 }
  0xab   :  { %222 = vst [vmem:[#allocation2 + $0x10] sm:$0xff] %v218_v44  ;;  %v217_v46 = vadd.f32 %v213_v43, %v205_v45 }
  0xac   :  { %v190_v47 = vpop.f32.mrf.mxu2 }
  0xad   :  { %221 = vst [vmem:[#allocation2 + $0x8] sm:$0xff] %v217_v46  ;;  %v191_v48 = vadd.f32 %v361_v28, %v190_v47  ;;  %v209_v49 = vpop.f32.mrf.mxu3 }
  0xaf   :  { %v210_v51 = vadd.f32 %v209_v49, %v191_v48 }
  0xb1   :  { %v219_v52 = vadd.f32 %v215_v50, %v210_v51 }
  0xb3   :  { %223 = vst [vmem:[#allocation2 + $0x18] sm:$0xff] %v219_v52 }
  0xb4   :  { %236 = dma.vmem_to_hbm [thread:$0]  %s229_s17, 512, %s231_s20, [#allocation3], %s389_s23, %s389_s23, %s390_s24  }
  0xb5   :  { %386 = dma.done.wait [#allocation3], 512  }
  0xb6   :  { %387 = vsyncadd [#allocation3], 4294966784 }
  0xb7   :  { %241 = vsyncpa [#allocation3], 1 }

</bundles_post_ra>
